<compile_context>
chip_gen: v5e
topology: v5e:2x2
jax: 0.10.0
libtpu: 0.0.40
codegen_flags: <defaults>
</compile_context>

<pallas_src>
import numpy as np

import jax
import jax.numpy as jnp
from jax.experimental import pallas as pl
from jax.experimental.pallas import tpu as pltpu

STFT_CHAN = 8
OUTPUT_CHAN = 4
BN_EPS = 1e-5
H = 16
W = 16
MXU_DTYPE = jnp.bfloat16      # MXU operand dtype (accumulation stays f32)

# (Cin, Cout, KH, KW, dil_h, dil_w, pad_h(top,bot), pad_w(left,right))
# mirrors the nn.Sequential in the PyTorch module.
LAYERS = [
    (2,          STFT_CHAN,   1, 3, 1, 1, (0, 0), (1, 1)),
    (STFT_CHAN,  STFT_CHAN,   3, 1, 1, 1, (1, 1), (0, 0)),
    (STFT_CHAN,  STFT_CHAN,   3, 3, 1, 1, (1, 1), (1, 1)),
    (STFT_CHAN,  STFT_CHAN,   3, 3, 2, 1, (2, 2), (1, 1)),
    (STFT_CHAN,  STFT_CHAN,   3, 3, 4, 1, (4, 4), (1, 1)),
    (STFT_CHAN,  OUTPUT_CHAN, 1, 1, 1, 1, (0, 0), (0, 0)),
]

# Max zero-padded height of any layer's input (4 + 16 + 4 = 24).
MAX_ROWS = max(pt + H + pb for (_, _, _, _, _, _, (pt, pb), _) in LAYERS)
BUF_COLS = W * STFT_CHAN      # 128 lanes — one full vreg row per image row


def _fused_stft_kernel(*refs):
    """Whole 6-layer stack for B_TILE batch elements, VMEM resident.

    refs = (x_ref, [w, scale, shift] * 6, o_ref, buf0, buf1)
      x_ref : (B_TILE, Cin0, H, W)     NCHW input block
      w_l   : (KH_l, W*Cin, W*Cout)    bf16 block weights (W taps + W pad folded)
      s_l/b_l: (1, W*Cout)             folded BN scale / shift (channel-major lanes)
      o_ref : (B_TILE, Cout, H, W)     NCHW output block
      buf0/buf1 : (B_TILE, MAX_ROWS, 128) f32 ping-pong activation scratch
    """
    n_layers = len(LAYERS)
    x_ref = refs[0]
    layer_refs = refs[1:1 + 3 * n_layers]
    o_ref = refs[1 + 3 * n_layers]
    buf0, buf1 = refs[2 + 3 * n_layers:]
    bufs = (buf0, buf1)

    b_tile = x_ref.shape[0]
    m_rows = b_tile * H

    # Prologue: NCHW -> channel-major lanes (lane = c*W + w).  Layer 0 has no
    # H padding, so only the H data rows / Cin0*W lanes are written; nothing
    # else of buf0 is read by layer 0 (stale rows/lanes are never touched).
    cin0 = LAYERS[0][0]
    for c in range(cin0):
        buf0[:, 0:H, c * W:(c + 1) * W] = x_ref[:, c, :, :]

    cur = 0
    for l, (Cin, Cout, KH, _KW, dh, _dw, _ph, _pw) in enumerate(LAYERS):
        w_ref = layer_refs[3 * l + 0]
        s_ref = layer_refs[3 * l + 1]
        b_ref = layer_refs[3 * l + 2]
        cin_cols = W * Cin
        cout_cols = W * Cout
        src = bufs[cur]

        # One MXU matmul per H-tap with M = B_TILE*H rows; the W-direction taps
        # AND the W zero-padding are folded into the (W*Cin, W*Cout) block
        # weight.  Operands bf16, accumulation f32.
        def tap(kh):
            x_tap = src[:, kh * dh:kh * dh + H, 0:cin_cols]
            x_tap = x_tap.astype(MXU_DTYPE).reshape(m_rows, cin_cols)
            return jnp.dot(x_tap, w_ref[kh], preferred_element_type=jnp.float32)

        acc = tap(0)                      # init from first tap (no zeros + add)
        for kh in range(1, KH):
            acc = acc + tap(kh)

        # Folded BatchNorm (+ conv bias) and ReLU on the VPU, in f32.
        y = jnp.maximum(acc * s_ref[...] + b_ref[...], 0.0)

        if l == n_layers - 1:
            # channel-major lanes -> NCHW output block (no wrapper transpose).
            y3 = y.reshape(b_tile, H, cout_cols)
            for c in range(Cout):
                o_ref[:, c, :, :] = y3[:, :, c * W:(c + 1) * W].astype(o_ref.dtype)
        else:
            npt, npb = LAYERS[l + 1][6]
            dst = bufs[1 - cur]
            # Zero ONLY the H-pad rows the next layer actually reads
            # (its last tap reads up to row npt + H + npb - 1).
            if npt > 0:
                dst[:, 0:npt, 0:cout_cols] = jnp.zeros(
                    (b_tile, npt, cout_cols), jnp.float32)
            if npb > 0:
                dst[:, npt + H:npt + H + npb, 0:cout_cols] = jnp.zeros(
                    (b_tile, npb, cout_cols), jnp.float32)
            dst[:, npt:npt + H, 0:cout_cols] = y.reshape(b_tile, H, cout_cols)
            cur = 1 - cur


def init_layer(key, Cin, Cout, KH, KW):
    """Deterministic synthetic Conv2d + BatchNorm2d parameters, BN pre-folded."""
    k1, k2, k3, k4, k5, k6 = jax.random.split(key, 6)
    bound = 1.0 / jnp.sqrt(jnp.float32(Cin * KH * KW))
    w = jax.random.uniform(k1, (KH, KW, Cin, Cout), jnp.float32, -bound, bound)
    conv_b = jax.random.uniform(k2, (Cout,), jnp.float32, -bound, bound)
    gamma = 1.0 + 0.1 * jax.random.normal(k3, (Cout,), jnp.float32)
    beta = 0.1 * jax.random.normal(k4, (Cout,), jnp.float32)
    r_mean = 0.1 * jax.random.normal(k5, (Cout,), jnp.float32)
    r_var = 1.0 + 0.1 * jax.random.uniform(k6, (Cout,), jnp.float32)
    scale = gamma / jnp.sqrt(r_var + BN_EPS)
    shift = (conv_b - r_mean) * scale + beta
    return w, scale, shift


def build_pallas_params(params):
    """Host-side prep.

    Folds W taps + W zero-padding of each conv into a block-structured
    (KH, W*Cin, W*Cout) matmul weight in bf16, using CHANNEL-MAJOR lane layout
    (lane = c*W + w) on both sides so the kernel can consume/produce NCHW
    directly.  BN scale/shift are tiled to the same lane layout (f32).
    """
    prepared = []
    for (Cin, Cout, KH, KW, _dh, dw, _ph, (pw_l, _pw_r)), (w, scale, shift) in zip(
            LAYERS, params):
        w_np = np.asarray(w, np.float32)                 # (KH, KW, Cin, Cout)
        B = np.zeros((KH, W * Cin, W * Cout), np.float32)
        for kh in range(KH):
            for kw in range(KW):
                for wo in range(W):
                    wi = wo + kw * dw - pw_l
                    if 0 <= wi < W:                      # out-of-range == zero pad
                        for ci in range(Cin):
                            # rows: ci*W + wi ; cols: co*W + wo  (channel-major)
                            B[kh, ci * W + wi, wo::W] += w_np[kh, kw, ci, :]
        s_t = jnp.asarray(np.repeat(np.asarray(scale, np.float32), W)[None, :])
        b_t = jnp.asarray(np.repeat(np.asarray(shift, np.float32), W)[None, :])
        prepared.append((jnp.asarray(B, MXU_DTYPE), s_t, b_t))
    return prepared


def stft_feature_extractor(x_nchw, prepared_params, *, b_tile=8):
    """Fused Pallas forward.  x_nchw: (N, 2, H, W) -> (N, 4, H, W), like PyTorch."""
    N = x_nchw.shape[0]
    cin0 = LAYERS[0][0]
    # Batch tile: target M = b_tile*H ~ 128 rows for the MXU.  For v7x keep
    # b_tile <= ceil(N/2) when possible so the "parallel" grid has >= 2 steps.
    b_tile = max(1, min(int(b_tile), N))
    n_pad = ((N + b_tile - 1) // b_tile) * b_tile
    if n_pad != N:
        x_nchw = jnp.concatenate(
            [x_nchw, jnp.zeros((n_pad - N, cin0, H, W), x_nchw.dtype)], axis=0)

    flat_inputs = [x_nchw]
    in_specs = [pl.BlockSpec((b_tile, cin0, H, W), lambda n: (n, 0, 0, 0))]
    for (Bw, s_t, b_t) in prepared_params:
        flat_inputs += [Bw, s_t, b_t]
        in_specs += [
            pl.BlockSpec(Bw.shape, lambda n: (0, 0, 0)),   # constant: DMA'd once
            pl.BlockSpec(s_t.shape, lambda n: (0, 0)),
            pl.BlockSpec(b_t.shape, lambda n: (0, 0)),
        ]

    out = pl.pallas_call(
        _fused_stft_kernel,
        out_shape=jax.ShapeDtypeStruct((n_pad, OUTPUT_CHAN, H, W), jnp.float32),
        grid=(n_pad // b_tile,),
        in_specs=in_specs,
        out_specs=pl.BlockSpec((b_tile, OUTPUT_CHAN, H, W),
                               lambda n: (n, 0, 0, 0)),
        scratch_shapes=[pltpu.VMEM((b_tile, MAX_ROWS, BUF_COLS), jnp.float32),
                        pltpu.VMEM((b_tile, MAX_ROWS, BUF_COLS), jnp.float32)],
        compiler_params=pltpu.CompilerParams(
            dimension_semantics=("parallel",)),   # batch tiles across TCs (v7x)
    )(*flat_inputs)
    return out[:N]


def reference(x_nchw, params, matmul_dtype=jnp.float32):
    """Pure-JAX reference (lax conv).  matmul_dtype=bf16 mirrors the kernel's
    MXU operand precision (f32 accumulation) for a tight numerical check."""
    x = jnp.transpose(x_nchw, (0, 2, 3, 1))
    for (Cin, Cout, KH, KW, dh, dw, ph, pw), (w, scale, shift) in zip(LAYERS, params):
        xp = jnp.pad(x, ((0, 0), ph, pw, (0, 0)))
        y = jax.lax.conv_general_dilated(
            xp.astype(matmul_dtype), w.astype(matmul_dtype),
            window_strides=(1, 1), padding="VALID",
            rhs_dilation=(dh, dw),
            dimension_numbers=("NHWC", "HWIO", "NHWC"),
            preferred_element_type=jnp.float32)
        x = jnp.maximum(y * scale + shift, 0.0)
    return jnp.transpose(x, (0, 3, 1, 2))


if __name__ == "__main__":
    key = jax.random.PRNGKey(0)
    kx, kx2, kp = jax.random.split(key, 3)

    pkeys = jax.random.split(kp, len(LAYERS))
    params = [init_layer(k, c[0], c[1], c[2], c[3])
              for k, c in zip(pkeys, LAYERS)]
    prepared = build_pallas_params(params)

    # Small PyTorch-style NCHW input: (batch=2, channels=2, H=16, W=16).
    x = jax.random.normal(kx, (2, 2, H, W), jnp.float32)
    out = jax.block_until_ready(stft_feature_extractor(x, prepared, b_tile=8))
    assert out.shape == (2, OUTPUT_CHAN, H, W), out.shape

    ref_bf16 = reference(x, params, jnp.bfloat16)   # kernel-precision reference
    ref_f32 = reference(x, params, jnp.float32)     # original-module precision
    err_bf16 = float(jnp.max(jnp.abs(out - ref_bf16)))
    err_f32 = float(jnp.max(jnp.abs(out - ref_f32)))
    assert jnp.allclose(out, ref_bf16, atol=2e-2, rtol=2e-2), err_bf16
    assert jnp.allclose(out, ref_f32, atol=5e-2, rtol=5e-2), err_f32

    # Larger batch: 2 grid steps of b_tile=8 (M=128 matmuls; on v7x the
    # "parallel" batch axis gives one step per TensorCore).
    x16 = jax.random.normal(kx2, (16, 2, H, W), jnp.float32)
    out16 = jax.block_until_ready(stft_feature_extractor(x16, prepared, b_tile=8))
    ref16 = reference(x16, params, jnp.bfloat16)
    assert out16.shape == (16, OUTPUT_CHAN, H, W), out16.shape
    assert jnp.allclose(out16, ref16, atol=2e-2, rtol=2e-2), \
        float(jnp.max(jnp.abs(out16 - ref16)))

    print("KERNEL_OK")
</pallas_src>

<mosaic_0001>
module attributes {stable_mosaic.version = 11 : i64} {
  func.func @_fused_stft_kernel(%arg0: i32, %arg1: memref<2x2x16x16xf32, #tpu.memory_space<vmem>>, %arg2: memref<1x32x128xbf16, #tpu.memory_space<vmem>>, %arg3: memref<1x128xf32, #tpu.memory_space<vmem>>, %arg4: memref<1x128xf32, #tpu.memory_space<vmem>>, %arg5: memref<3x128x128xbf16, #tpu.memory_space<vmem>>, %arg6: memref<1x128xf32, #tpu.memory_space<vmem>>, %arg7: memref<1x128xf32, #tpu.memory_space<vmem>>, %arg8: memref<3x128x128xbf16, #tpu.memory_space<vmem>>, %arg9: memref<1x128xf32, #tpu.memory_space<vmem>>, %arg10: memref<1x128xf32, #tpu.memory_space<vmem>>, %arg11: memref<3x128x128xbf16, #tpu.memory_space<vmem>>, %arg12: memref<1x128xf32, #tpu.memory_space<vmem>>, %arg13: memref<1x128xf32, #tpu.memory_space<vmem>>, %arg14: memref<3x128x128xbf16, #tpu.memory_space<vmem>>, %arg15: memref<1x128xf32, #tpu.memory_space<vmem>>, %arg16: memref<1x128xf32, #tpu.memory_space<vmem>>, %arg17: memref<1x128x64xbf16, #tpu.memory_space<vmem>>, %arg18: memref<1x64xf32, #tpu.memory_space<vmem>>, %arg19: memref<1x64xf32, #tpu.memory_space<vmem>>, %arg20: memref<2x4x16x16xf32, #tpu.memory_space<vmem>>, %arg21: memref<2x24x128xf32, #tpu.memory_space<vmem>>, %arg22: memref<2x24x128xf32, #tpu.memory_space<vmem>>) attributes {dimension_semantics = [#tpu.dimension_semantics<parallel>], iteration_bounds = array<i64: 1>, scalar_prefetch = 0 : i64, scratch_operands = 2 : i64, tpu.core_type = #tpu.core_type<tc>, window_params = [{transform_indices = @transform_0, window_bounds = array<i64: 2, 2, 16, 16>}, {pipeline_mode = #tpu.pipeline_mode<synchronous>, transform_indices = @transform_1, window_bounds = array<i64: 1, 32, 128>}, {pipeline_mode = #tpu.pipeline_mode<synchronous>, transform_indices = @transform_2, window_bounds = array<i64: 1, 128>}, {pipeline_mode = #tpu.pipeline_mode<synchronous>, transform_indices = @transform_3, window_bounds = array<i64: 1, 128>}, {pipeline_mode = #tpu.pipeline_mode<synchronous>, transform_indices = @transform_4, window_bounds = array<i64: 3, 128, 128>}, {pipeline_mode = #tpu.pipeline_mode<synchronous>, transform_indices = @transform_5, window_bounds = array<i64: 1, 128>}, {pipeline_mode = #tpu.pipeline_mode<synchronous>, transform_indices = @transform_6, window_bounds = array<i64: 1, 128>}, {pipeline_mode = #tpu.pipeline_mode<synchronous>, transform_indices = @transform_7, window_bounds = array<i64: 3, 128, 128>}, {pipeline_mode = #tpu.pipeline_mode<synchronous>, transform_indices = @transform_8, window_bounds = array<i64: 1, 128>}, {pipeline_mode = #tpu.pipeline_mode<synchronous>, transform_indices = @transform_9, window_bounds = array<i64: 1, 128>}, {pipeline_mode = #tpu.pipeline_mode<synchronous>, transform_indices = @transform_10, window_bounds = array<i64: 3, 128, 128>}, {pipeline_mode = #tpu.pipeline_mode<synchronous>, transform_indices = @transform_11, window_bounds = array<i64: 1, 128>}, {pipeline_mode = #tpu.pipeline_mode<synchronous>, transform_indices = @transform_12, window_bounds = array<i64: 1, 128>}, {pipeline_mode = #tpu.pipeline_mode<synchronous>, transform_indices = @transform_13, window_bounds = array<i64: 3, 128, 128>}, {pipeline_mode = #tpu.pipeline_mode<synchronous>, transform_indices = @transform_14, window_bounds = array<i64: 1, 128>}, {pipeline_mode = #tpu.pipeline_mode<synchronous>, transform_indices = @transform_15, window_bounds = array<i64: 1, 128>}, {pipeline_mode = #tpu.pipeline_mode<synchronous>, transform_indices = @transform_16, window_bounds = array<i64: 1, 128, 64>}, {pipeline_mode = #tpu.pipeline_mode<synchronous>, transform_indices = @transform_17, window_bounds = array<i64: 1, 64>}, {pipeline_mode = #tpu.pipeline_mode<synchronous>, transform_indices = @transform_18, window_bounds = array<i64: 1, 64>}, {transform_indices = @transform_19, window_bounds = array<i64: 2, 4, 16, 16>}]} {
    %c0 = arith.constant 0 : index
    %c0_0 = arith.constant 0 : index
    %c0_1 = arith.constant 0 : index
    %c0_2 = arith.constant 0 : index
    %0 = vector.load %arg1[%c0, %c0_0, %c0_1, %c0_2] : memref<2x2x16x16xf32, #tpu.memory_space<vmem>>, vector<2x1x16x16xf32>
    %1 = vector.shape_cast %0 : vector<2x1x16x16xf32> to vector<2x16x16xf32>
    %c0_3 = arith.constant 0 : index
    %c0_4 = arith.constant 0 : index
    %c0_5 = arith.constant 0 : index
    %2 = vector.load %arg21[%c0_3, %c0_4, %c0_5] : memref<2x24x128xf32, #tpu.memory_space<vmem>>, vector<2x16x16xf32>
    tpu.vector_store %arg21[%c0_3, %c0_4, %c0_5], %1 {strides = array<i32>} : memref<2x24x128xf32, #tpu.memory_space<vmem>>, vector<2x16x16xf32>,
    %c0_6 = arith.constant 0 : index
    %c1 = arith.constant 1 : index
    %c0_7 = arith.constant 0 : index
    %c0_8 = arith.constant 0 : index
    %3 = vector.load %arg1[%c0_6, %c1, %c0_7, %c0_8] : memref<2x2x16x16xf32, #tpu.memory_space<vmem>>, vector<2x1x16x16xf32>
    %4 = vector.shape_cast %3 : vector<2x1x16x16xf32> to vector<2x16x16xf32>
    %c0_9 = arith.constant 0 : index
    %c0_10 = arith.constant 0 : index
    %c16 = arith.constant 16 : index
    %5 = vector.load %arg21[%c0_9, %c0_10, %c16] : memref<2x24x128xf32, #tpu.memory_space<vmem>>, vector<2x16x16xf32>
    tpu.vector_store %arg21[%c0_9, %c0_10, %c16], %4 {strides = array<i32>} : memref<2x24x128xf32, #tpu.memory_space<vmem>>, vector<2x16x16xf32>,
    %c0_11 = arith.constant 0 : index
    %c0_12 = arith.constant 0 : index
    %c0_13 = arith.constant 0 : index
    %6 = vector.load %arg21[%c0_11, %c0_12, %c0_13] : memref<2x24x128xf32, #tpu.memory_space<vmem>>, vector<2x16x32xf32>
    %7 = arith.truncf %6 : vector<2x16x32xf32> to vector<2x16x32xbf16>
    %8 = vector.shape_cast %7 : vector<2x16x32xbf16> to vector<32x32xbf16>
    %c0_14 = arith.constant 0 : index
    %c0_15 = arith.constant 0 : index
    %c0_16 = arith.constant 0 : index
    %9 = vector.load %arg2[%c0_14, %c0_15, %c0_16] : memref<1x32x128xbf16, #tpu.memory_space<vmem>>, vector<1x32x128xbf16>
    %10 = vector.shape_cast %9 : vector<1x32x128xbf16> to vector<32x128xbf16>
    %cst = arith.constant dense<0.000000e+00> : vector<32x128xf32>
    %11 = tpu.matmul %8, %10, %cst {dimension_numbers = #tpu.dot_dimension_numbers<[1], [0], [0], [1], [0, 0, 1, 1], [], []>} : vector<32x32xbf16>, vector<32x128xbf16>, vector<32x128xf32> -> vector<32x128xf32>
    %c0_17 = arith.constant 0 : index
    %c0_18 = arith.constant 0 : index
    %12 = vector.load %arg3[%c0_17, %c0_18] : memref<1x128xf32, #tpu.memory_space<vmem>>, vector<1x128xf32>
    %13 = vector.broadcast %12 : vector<1x128xf32> to vector<32x128xf32>
    %14 = arith.mulf %11, %13 : vector<32x128xf32>
    %c0_19 = arith.constant 0 : index
    %c0_20 = arith.constant 0 : index
    %15 = vector.load %arg4[%c0_19, %c0_20] : memref<1x128xf32, #tpu.memory_space<vmem>>, vector<1x128xf32>
    %16 = vector.broadcast %15 : vector<1x128xf32> to vector<32x128xf32>
    %17 = arith.addf %14, %16 : vector<32x128xf32>
    %cst_21 = arith.constant 0.000000e+00 : f32
    %18 = vector.broadcast %cst_21 : f32 to vector<32x128xf32>
    %19 = arith.maximumf %17, %18 : vector<32x128xf32>
    %cst_22 = arith.constant 0.000000e+00 : f32
    %20 = vector.broadcast %cst_22 : f32 to vector<2x1x128xf32>
    %c0_23 = arith.constant 0 : index
    %c0_24 = arith.constant 0 : index
    %c0_25 = arith.constant 0 : index
    %21 = vector.load %arg22[%c0_23, %c0_24, %c0_25] : memref<2x24x128xf32, #tpu.memory_space<vmem>>, vector<2x1x128xf32>
    tpu.vector_store %arg22[%c0_23, %c0_24, %c0_25], %20 {strides = array<i32>} : memref<2x24x128xf32, #tpu.memory_space<vmem>>, vector<2x1x128xf32>,
    %cst_26 = arith.constant 0.000000e+00 : f32
    %22 = vector.broadcast %cst_26 : f32 to vector<2x1x128xf32>
    %c0_27 = arith.constant 0 : index
    %c17 = arith.constant 17 : index
    %c0_28 = arith.constant 0 : index
    %23 = vector.load %arg22[%c0_27, %c17, %c0_28] : memref<2x24x128xf32, #tpu.memory_space<vmem>>, vector<2x1x128xf32>
    tpu.vector_store %arg22[%c0_27, %c17, %c0_28], %22 {strides = array<i32>} : memref<2x24x128xf32, #tpu.memory_space<vmem>>, vector<2x1x128xf32>,
    %24 = vector.shape_cast %19 : vector<32x128xf32> to vector<2x16x128xf32>
    %c0_29 = arith.constant 0 : index
    %c1_30 = arith.constant 1 : index
    %c0_31 = arith.constant 0 : index
    %25 = vector.load %arg22[%c0_29, %c1_30, %c0_31] : memref<2x24x128xf32, #tpu.memory_space<vmem>>, vector<2x16x128xf32>
    tpu.vector_store %arg22[%c0_29, %c1_30, %c0_31], %24 {strides = array<i32>} : memref<2x24x128xf32, #tpu.memory_space<vmem>>, vector<2x16x128xf32>,
    %c0_32 = arith.constant 0 : index
    %c0_33 = arith.constant 0 : index
    %c0_34 = arith.constant 0 : index
    %26 = vector.load %arg22[%c0_32, %c0_33, %c0_34] : memref<2x24x128xf32, #tpu.memory_space<vmem>>, vector<2x16x128xf32>
    %27 = arith.truncf %26 : vector<2x16x128xf32> to vector<2x16x128xbf16>
    %28 = vector.shape_cast %27 : vector<2x16x128xbf16> to vector<32x128xbf16>
    %c0_35 = arith.constant 0 : index
    %c0_36 = arith.constant 0 : index
    %c0_37 = arith.constant 0 : index
    %29 = vector.load %arg5[%c0_35, %c0_36, %c0_37] : memref<3x128x128xbf16, #tpu.memory_space<vmem>>, vector<1x128x128xbf16>
    %30 = vector.shape_cast %29 : vector<1x128x128xbf16> to vector<128x128xbf16>
    %cst_38 = arith.constant dense<0.000000e+00> : vector<32x128xf32>
    %31 = tpu.matmul %28, %30, %cst_38 {dimension_numbers = #tpu.dot_dimension_numbers<[1], [0], [0], [1], [0, 0, 1, 1], [], []>} : vector<32x128xbf16>, vector<128x128xbf16>, vector<32x128xf32> -> vector<32x128xf32>
    %c0_39 = arith.constant 0 : index
    %c1_40 = arith.constant 1 : index
    %c0_41 = arith.constant 0 : index
    %32 = vector.load %arg22[%c0_39, %c1_40, %c0_41] : memref<2x24x128xf32, #tpu.memory_space<vmem>>, vector<2x16x128xf32>
    %33 = arith.truncf %32 : vector<2x16x128xf32> to vector<2x16x128xbf16>
    %34 = vector.shape_cast %33 : vector<2x16x128xbf16> to vector<32x128xbf16>
    %c1_42 = arith.constant 1 : index
    %c0_43 = arith.constant 0 : index
    %c0_44 = arith.constant 0 : index
    %35 = vector.load %arg5[%c1_42, %c0_43, %c0_44] : memref<3x128x128xbf16, #tpu.memory_space<vmem>>, vector<1x128x128xbf16>
    %36 = vector.shape_cast %35 : vector<1x128x128xbf16> to vector<128x128xbf16>
    %cst_45 = arith.constant dense<0.000000e+00> : vector<32x128xf32>
    %37 = tpu.matmul %34, %36, %cst_45 {dimension_numbers = #tpu.dot_dimension_numbers<[1], [0], [0], [1], [0, 0, 1, 1], [], []>} : vector<32x128xbf16>, vector<128x128xbf16>, vector<32x128xf32> -> vector<32x128xf32>
    %38 = arith.addf %31, %37 : vector<32x128xf32>
    %c0_46 = arith.constant 0 : index
    %c2 = arith.constant 2 : index
    %c0_47 = arith.constant 0 : index
    %39 = vector.load %arg22[%c0_46, %c2, %c0_47] : memref<2x24x128xf32, #tpu.memory_space<vmem>>, vector<2x16x128xf32>
    %40 = arith.truncf %39 : vector<2x16x128xf32> to vector<2x16x128xbf16>
    %41 = vector.shape_cast %40 : vector<2x16x128xbf16> to vector<32x128xbf16>
    %c2_48 = arith.constant 2 : index
    %c0_49 = arith.constant 0 : index
    %c0_50 = arith.constant 0 : index
    %42 = vector.load %arg5[%c2_48, %c0_49, %c0_50] : memref<3x128x128xbf16, #tpu.memory_space<vmem>>, vector<1x128x128xbf16>
    %43 = vector.shape_cast %42 : vector<1x128x128xbf16> to vector<128x128xbf16>
    %cst_51 = arith.constant dense<0.000000e+00> : vector<32x128xf32>
    %44 = tpu.matmul %41, %43, %cst_51 {dimension_numbers = #tpu.dot_dimension_numbers<[1], [0], [0], [1], [0, 0, 1, 1], [], []>} : vector<32x128xbf16>, vector<128x128xbf16>, vector<32x128xf32> -> vector<32x128xf32>
    %45 = arith.addf %38, %44 : vector<32x128xf32>
    %c0_52 = arith.constant 0 : index
    %c0_53 = arith.constant 0 : index
    %46 = vector.load %arg6[%c0_52, %c0_53] : memref<1x128xf32, #tpu.memory_space<vmem>>, vector<1x128xf32>
    %47 = vector.broadcast %46 : vector<1x128xf32> to vector<32x128xf32>
    %48 = arith.mulf %45, %47 : vector<32x128xf32>
    %c0_54 = arith.constant 0 : index
    %c0_55 = arith.constant 0 : index
    %49 = vector.load %arg7[%c0_54, %c0_55] : memref<1x128xf32, #tpu.memory_space<vmem>>, vector<1x128xf32>
    %50 = vector.broadcast %49 : vector<1x128xf32> to vector<32x128xf32>
    %51 = arith.addf %48, %50 : vector<32x128xf32>
    %cst_56 = arith.constant 0.000000e+00 : f32
    %52 = vector.broadcast %cst_56 : f32 to vector<32x128xf32>
    %53 = arith.maximumf %51, %52 : vector<32x128xf32>
    %cst_57 = arith.constant 0.000000e+00 : f32
    %54 = vector.broadcast %cst_57 : f32 to vector<2x1x128xf32>
    %c0_58 = arith.constant 0 : index
    %c0_59 = arith.constant 0 : index
    %c0_60 = arith.constant 0 : index
    %55 = vector.load %arg21[%c0_58, %c0_59, %c0_60] : memref<2x24x128xf32, #tpu.memory_space<vmem>>, vector<2x1x128xf32>
    tpu.vector_store %arg21[%c0_58, %c0_59, %c0_60], %54 {strides = array<i32>} : memref<2x24x128xf32, #tpu.memory_space<vmem>>, vector<2x1x128xf32>,
    %cst_61 = arith.constant 0.000000e+00 : f32
    %56 = vector.broadcast %cst_61 : f32 to vector<2x1x128xf32>
    %c0_62 = arith.constant 0 : index
    %c17_63 = arith.constant 17 : index
    %c0_64 = arith.constant 0 : index
    %57 = vector.load %arg21[%c0_62, %c17_63, %c0_64] : memref<2x24x128xf32, #tpu.memory_space<vmem>>, vector<2x1x128xf32>
    tpu.vector_store %arg21[%c0_62, %c17_63, %c0_64], %56 {strides = array<i32>} : memref<2x24x128xf32, #tpu.memory_space<vmem>>, vector<2x1x128xf32>,
    %58 = vector.shape_cast %53 : vector<32x128xf32> to vector<2x16x128xf32>
    %c0_65 = arith.constant 0 : index
    %c1_66 = arith.constant 1 : index
    %c0_67 = arith.constant 0 : index
    %59 = vector.load %arg21[%c0_65, %c1_66, %c0_67] : memref<2x24x128xf32, #tpu.memory_space<vmem>>, vector<2x16x128xf32>
    tpu.vector_store %arg21[%c0_65, %c1_66, %c0_67], %58 {strides = array<i32>} : memref<2x24x128xf32, #tpu.memory_space<vmem>>, vector<2x16x128xf32>,
    %c0_68 = arith.constant 0 : index
    %c0_69 = arith.constant 0 : index
    %c0_70 = arith.constant 0 : index
    %60 = vector.load %arg21[%c0_68, %c0_69, %c0_70] : memref<2x24x128xf32, #tpu.memory_space<vmem>>, vector<2x16x128xf32>
    %61 = arith.truncf %60 : vector<2x16x128xf32> to vector<2x16x128xbf16>
    %62 = vector.shape_cast %61 : vector<2x16x128xbf16> to vector<32x128xbf16>
    %c0_71 = arith.constant 0 : index
    %c0_72 = arith.constant 0 : index
    %c0_73 = arith.constant 0 : index
    %63 = vector.load %arg8[%c0_71, %c0_72, %c0_73] : memref<3x128x128xbf16, #tpu.memory_space<vmem>>, vector<1x128x128xbf16>
    %64 = vector.shape_cast %63 : vector<1x128x128xbf16> to vector<128x128xbf16>
    %cst_74 = arith.constant dense<0.000000e+00> : vector<32x128xf32>
    %65 = tpu.matmul %62, %64, %cst_74 {dimension_numbers = #tpu.dot_dimension_numbers<[1], [0], [0], [1], [0, 0, 1, 1], [], []>} : vector<32x128xbf16>, vector<128x128xbf16>, vector<32x128xf32> -> vector<32x128xf32>
    %c0_75 = arith.constant 0 : index
    %c1_76 = arith.constant 1 : index
    %c0_77 = arith.constant 0 : index
    %66 = vector.load %arg21[%c0_75, %c1_76, %c0_77] : memref<2x24x128xf32, #tpu.memory_space<vmem>>, vector<2x16x128xf32>
    %67 = arith.truncf %66 : vector<2x16x128xf32> to vector<2x16x128xbf16>
    %68 = vector.shape_cast %67 : vector<2x16x128xbf16> to vector<32x128xbf16>
    %c1_78 = arith.constant 1 : index
    %c0_79 = arith.constant 0 : index
    %c0_80 = arith.constant 0 : index
    %69 = vector.load %arg8[%c1_78, %c0_79, %c0_80] : memref<3x128x128xbf16, #tpu.memory_space<vmem>>, vector<1x128x128xbf16>
    %70 = vector.shape_cast %69 : vector<1x128x128xbf16> to vector<128x128xbf16>
    %cst_81 = arith.constant dense<0.000000e+00> : vector<32x128xf32>
    %71 = tpu.matmul %68, %70, %cst_81 {dimension_numbers = #tpu.dot_dimension_numbers<[1], [0], [0], [1], [0, 0, 1, 1], [], []>} : vector<32x128xbf16>, vector<128x128xbf16>, vector<32x128xf32> -> vector<32x128xf32>
    %72 = arith.addf %65, %71 : vector<32x128xf32>
    %c0_82 = arith.constant 0 : index
    %c2_83 = arith.constant 2 : index
    %c0_84 = arith.constant 0 : index
    %73 = vector.load %arg21[%c0_82, %c2_83, %c0_84] : memref<2x24x128xf32, #tpu.memory_space<vmem>>, vector<2x16x128xf32>
    %74 = arith.truncf %73 : vector<2x16x128xf32> to vector<2x16x128xbf16>
    %75 = vector.shape_cast %74 : vector<2x16x128xbf16> to vector<32x128xbf16>
    %c2_85 = arith.constant 2 : index
    %c0_86 = arith.constant 0 : index
    %c0_87 = arith.constant 0 : index
    %76 = vector.load %arg8[%c2_85, %c0_86, %c0_87] : memref<3x128x128xbf16, #tpu.memory_space<vmem>>, vector<1x128x128xbf16>
    %77 = vector.shape_cast %76 : vector<1x128x128xbf16> to vector<128x128xbf16>
    %cst_88 = arith.constant dense<0.000000e+00> : vector<32x128xf32>
    %78 = tpu.matmul %75, %77, %cst_88 {dimension_numbers = #tpu.dot_dimension_numbers<[1], [0], [0], [1], [0, 0, 1, 1], [], []>} : vector<32x128xbf16>, vector<128x128xbf16>, vector<32x128xf32> -> vector<32x128xf32>
    %79 = arith.addf %72, %78 : vector<32x128xf32>
    %c0_89 = arith.constant 0 : index
    %c0_90 = arith.constant 0 : index
    %80 = vector.load %arg9[%c0_89, %c0_90] : memref<1x128xf32, #tpu.memory_space<vmem>>, vector<1x128xf32>
    %81 = vector.broadcast %80 : vector<1x128xf32> to vector<32x128xf32>
    %82 = arith.mulf %79, %81 : vector<32x128xf32>
    %c0_91 = arith.constant 0 : index
    %c0_92 = arith.constant 0 : index
    %83 = vector.load %arg10[%c0_91, %c0_92] : memref<1x128xf32, #tpu.memory_space<vmem>>, vector<1x128xf32>
    %84 = vector.broadcast %83 : vector<1x128xf32> to vector<32x128xf32>
    %85 = arith.addf %82, %84 : vector<32x128xf32>
    %cst_93 = arith.constant 0.000000e+00 : f32
    %86 = vector.broadcast %cst_93 : f32 to vector<32x128xf32>
    %87 = arith.maximumf %85, %86 : vector<32x128xf32>
    %cst_94 = arith.constant 0.000000e+00 : f32
    %88 = vector.broadcast %cst_94 : f32 to vector<2x2x128xf32>
    %c0_95 = arith.constant 0 : index
    %c0_96 = arith.constant 0 : index
    %c0_97 = arith.constant 0 : index
    %89 = vector.load %arg22[%c0_95, %c0_96, %c0_97] : memref<2x24x128xf32, #tpu.memory_space<vmem>>, vector<2x2x128xf32>
    tpu.vector_store %arg22[%c0_95, %c0_96, %c0_97], %88 {strides = array<i32>} : memref<2x24x128xf32, #tpu.memory_space<vmem>>, vector<2x2x128xf32>,
    %cst_98 = arith.constant 0.000000e+00 : f32
    %90 = vector.broadcast %cst_98 : f32 to vector<2x2x128xf32>
    %c0_99 = arith.constant 0 : index
    %c18 = arith.constant 18 : index
    %c0_100 = arith.constant 0 : index
    %91 = vector.load %arg22[%c0_99, %c18, %c0_100] : memref<2x24x128xf32, #tpu.memory_space<vmem>>, vector<2x2x128xf32>
    tpu.vector_store %arg22[%c0_99, %c18, %c0_100], %90 {strides = array<i32>} : memref<2x24x128xf32, #tpu.memory_space<vmem>>, vector<2x2x128xf32>,
    %92 = vector.shape_cast %87 : vector<32x128xf32> to vector<2x16x128xf32>
    %c0_101 = arith.constant 0 : index
    %c2_102 = arith.constant 2 : index
    %c0_103 = arith.constant 0 : index
    %93 = vector.load %arg22[%c0_101, %c2_102, %c0_103] : memref<2x24x128xf32, #tpu.memory_space<vmem>>, vector<2x16x128xf32>
    tpu.vector_store %arg22[%c0_101, %c2_102, %c0_103], %92 {strides = array<i32>} : memref<2x24x128xf32, #tpu.memory_space<vmem>>, vector<2x16x128xf32>,
    %c0_104 = arith.constant 0 : index
    %c0_105 = arith.constant 0 : index
    %c0_106 = arith.constant 0 : index
    %94 = vector.load %arg22[%c0_104, %c0_105, %c0_106] : memref<2x24x128xf32, #tpu.memory_space<vmem>>, vector<2x16x128xf32>
    %95 = arith.truncf %94 : vector<2x16x128xf32> to vector<2x16x128xbf16>
    %96 = vector.shape_cast %95 : vector<2x16x128xbf16> to vector<32x128xbf16>
    %c0_107 = arith.constant 0 : index
    %c0_108 = arith.constant 0 : index
    %c0_109 = arith.constant 0 : index
    %97 = vector.load %arg11[%c0_107, %c0_108, %c0_109] : memref<3x128x128xbf16, #tpu.memory_space<vmem>>, vector<1x128x128xbf16>
    %98 = vector.shape_cast %97 : vector<1x128x128xbf16> to vector<128x128xbf16>
    %cst_110 = arith.constant dense<0.000000e+00> : vector<32x128xf32>
    %99 = tpu.matmul %96, %98, %cst_110 {dimension_numbers = #tpu.dot_dimension_numbers<[1], [0], [0], [1], [0, 0, 1, 1], [], []>} : vector<32x128xbf16>, vector<128x128xbf16>, vector<32x128xf32> -> vector<32x128xf32>
    %c0_111 = arith.constant 0 : index
    %c2_112 = arith.constant 2 : index
    %c0_113 = arith.constant 0 : index
    %100 = vector.load %arg22[%c0_111, %c2_112, %c0_113] : memref<2x24x128xf32, #tpu.memory_space<vmem>>, vector<2x16x128xf32>
    %101 = arith.truncf %100 : vector<2x16x128xf32> to vector<2x16x128xbf16>
    %102 = vector.shape_cast %101 : vector<2x16x128xbf16> to vector<32x128xbf16>
    %c1_114 = arith.constant 1 : index
    %c0_115 = arith.constant 0 : index
    %c0_116 = arith.constant 0 : index
    %103 = vector.load %arg11[%c1_114, %c0_115, %c0_116] : memref<3x128x128xbf16, #tpu.memory_space<vmem>>, vector<1x128x128xbf16>
    %104 = vector.shape_cast %103 : vector<1x128x128xbf16> to vector<128x128xbf16>
    %cst_117 = arith.constant dense<0.000000e+00> : vector<32x128xf32>
    %105 = tpu.matmul %102, %104, %cst_117 {dimension_numbers = #tpu.dot_dimension_numbers<[1], [0], [0], [1], [0, 0, 1, 1], [], []>} : vector<32x128xbf16>, vector<128x128xbf16>, vector<32x128xf32> -> vector<32x128xf32>
    %106 = arith.addf %99, %105 : vector<32x128xf32>
    %c0_118 = arith.constant 0 : index
    %c4 = arith.constant 4 : index
    %c0_119 = arith.constant 0 : index
    %107 = vector.load %arg22[%c0_118, %c4, %c0_119] : memref<2x24x128xf32, #tpu.memory_space<vmem>>, vector<2x16x128xf32>
    %108 = arith.truncf %107 : vector<2x16x128xf32> to vector<2x16x128xbf16>
    %109 = vector.shape_cast %108 : vector<2x16x128xbf16> to vector<32x128xbf16>
    %c2_120 = arith.constant 2 : index
    %c0_121 = arith.constant 0 : index
    %c0_122 = arith.constant 0 : index
    %110 = vector.load %arg11[%c2_120, %c0_121, %c0_122] : memref<3x128x128xbf16, #tpu.memory_space<vmem>>, vector<1x128x128xbf16>
    %111 = vector.shape_cast %110 : vector<1x128x128xbf16> to vector<128x128xbf16>
    %cst_123 = arith.constant dense<0.000000e+00> : vector<32x128xf32>
    %112 = tpu.matmul %109, %111, %cst_123 {dimension_numbers = #tpu.dot_dimension_numbers<[1], [0], [0], [1], [0, 0, 1, 1], [], []>} : vector<32x128xbf16>, vector<128x128xbf16>, vector<32x128xf32> -> vector<32x128xf32>
    %113 = arith.addf %106, %112 : vector<32x128xf32>
    %c0_124 = arith.constant 0 : index
    %c0_125 = arith.constant 0 : index
    %114 = vector.load %arg12[%c0_124, %c0_125] : memref<1x128xf32, #tpu.memory_space<vmem>>, vector<1x128xf32>
    %115 = vector.broadcast %114 : vector<1x128xf32> to vector<32x128xf32>
    %116 = arith.mulf %113, %115 : vector<32x128xf32>
    %c0_126 = arith.constant 0 : index
    %c0_127 = arith.constant 0 : index
    %117 = vector.load %arg13[%c0_126, %c0_127] : memref<1x128xf32, #tpu.memory_space<vmem>>, vector<1x128xf32>
    %118 = vector.broadcast %117 : vector<1x128xf32> to vector<32x128xf32>
    %119 = arith.addf %116, %118 : vector<32x128xf32>
    %cst_128 = arith.constant 0.000000e+00 : f32
    %120 = vector.broadcast %cst_128 : f32 to vector<32x128xf32>
    %121 = arith.maximumf %119, %120 : vector<32x128xf32>
    %cst_129 = arith.constant 0.000000e+00 : f32
    %122 = vector.broadcast %cst_129 : f32 to vector<2x4x128xf32>
    %c0_130 = arith.constant 0 : index
    %c0_131 = arith.constant 0 : index
    %c0_132 = arith.constant 0 : index
    %123 = vector.load %arg21[%c0_130, %c0_131, %c0_132] : memref<2x24x128xf32, #tpu.memory_space<vmem>>, vector<2x4x128xf32>
    tpu.vector_store %arg21[%c0_130, %c0_131, %c0_132], %122 {strides = array<i32>} : memref<2x24x128xf32, #tpu.memory_space<vmem>>, vector<2x4x128xf32>,
    %cst_133 = arith.constant 0.000000e+00 : f32
    %124 = vector.broadcast %cst_133 : f32 to vector<2x4x128xf32>
    %c0_134 = arith.constant 0 : index
    %c20 = arith.constant 20 : index
    %c0_135 = arith.constant 0 : index
    %125 = vector.load %arg21[%c0_134, %c20, %c0_135] : memref<2x24x128xf32, #tpu.memory_space<vmem>>, vector<2x4x128xf32>
    tpu.vector_store %arg21[%c0_134, %c20, %c0_135], %124 {strides = array<i32>} : memref<2x24x128xf32, #tpu.memory_space<vmem>>, vector<2x4x128xf32>,
    %126 = vector.shape_cast %121 : vector<32x128xf32> to vector<2x16x128xf32>
    %c0_136 = arith.constant 0 : index
    %c4_137 = arith.constant 4 : index
    %c0_138 = arith.constant 0 : index
    %127 = vector.load %arg21[%c0_136, %c4_137, %c0_138] : memref<2x24x128xf32, #tpu.memory_space<vmem>>, vector<2x16x128xf32>
    tpu.vector_store %arg21[%c0_136, %c4_137, %c0_138], %126 {strides = array<i32>} : memref<2x24x128xf32, #tpu.memory_space<vmem>>, vector<2x16x128xf32>,
    %c0_139 = arith.constant 0 : index
    %c0_140 = arith.constant 0 : index
    %c0_141 = arith.constant 0 : index
    %128 = vector.load %arg21[%c0_139, %c0_140, %c0_141] : memref<2x24x128xf32, #tpu.memory_space<vmem>>, vector<2x16x128xf32>
    %129 = arith.truncf %128 : vector<2x16x128xf32> to vector<2x16x128xbf16>
    %130 = vector.shape_cast %129 : vector<2x16x128xbf16> to vector<32x128xbf16>
    %c0_142 = arith.constant 0 : index
    %c0_143 = arith.constant 0 : index
    %c0_144 = arith.constant 0 : index
    %131 = vector.load %arg14[%c0_142, %c0_143, %c0_144] : memref<3x128x128xbf16, #tpu.memory_space<vmem>>, vector<1x128x128xbf16>
    %132 = vector.shape_cast %131 : vector<1x128x128xbf16> to vector<128x128xbf16>
    %cst_145 = arith.constant dense<0.000000e+00> : vector<32x128xf32>
    %133 = tpu.matmul %130, %132, %cst_145 {dimension_numbers = #tpu.dot_dimension_numbers<[1], [0], [0], [1], [0, 0, 1, 1], [], []>} : vector<32x128xbf16>, vector<128x128xbf16>, vector<32x128xf32> -> vector<32x128xf32>
    %c0_146 = arith.constant 0 : index
    %c4_147 = arith.constant 4 : index
    %c0_148 = arith.constant 0 : index
    %134 = vector.load %arg21[%c0_146, %c4_147, %c0_148] : memref<2x24x128xf32, #tpu.memory_space<vmem>>, vector<2x16x128xf32>
    %135 = arith.truncf %134 : vector<2x16x128xf32> to vector<2x16x128xbf16>
    %136 = vector.shape_cast %135 : vector<2x16x128xbf16> to vector<32x128xbf16>
    %c1_149 = arith.constant 1 : index
    %c0_150 = arith.constant 0 : index
    %c0_151 = arith.constant 0 : index
    %137 = vector.load %arg14[%c1_149, %c0_150, %c0_151] : memref<3x128x128xbf16, #tpu.memory_space<vmem>>, vector<1x128x128xbf16>
    %138 = vector.shape_cast %137 : vector<1x128x128xbf16> to vector<128x128xbf16>
    %cst_152 = arith.constant dense<0.000000e+00> : vector<32x128xf32>
    %139 = tpu.matmul %136, %138, %cst_152 {dimension_numbers = #tpu.dot_dimension_numbers<[1], [0], [0], [1], [0, 0, 1, 1], [], []>} : vector<32x128xbf16>, vector<128x128xbf16>, vector<32x128xf32> -> vector<32x128xf32>
    %140 = arith.addf %133, %139 : vector<32x128xf32>
    %c0_153 = arith.constant 0 : index
    %c8 = arith.constant 8 : index
    %c0_154 = arith.constant 0 : index
    %141 = vector.load %arg21[%c0_153, %c8, %c0_154] : memref<2x24x128xf32, #tpu.memory_space<vmem>>, vector<2x16x128xf32>
    %142 = arith.truncf %141 : vector<2x16x128xf32> to vector<2x16x128xbf16>
    %143 = vector.shape_cast %142 : vector<2x16x128xbf16> to vector<32x128xbf16>
    %c2_155 = arith.constant 2 : index
    %c0_156 = arith.constant 0 : index
    %c0_157 = arith.constant 0 : index
    %144 = vector.load %arg14[%c2_155, %c0_156, %c0_157] : memref<3x128x128xbf16, #tpu.memory_space<vmem>>, vector<1x128x128xbf16>
    %145 = vector.shape_cast %144 : vector<1x128x128xbf16> to vector<128x128xbf16>
    %cst_158 = arith.constant dense<0.000000e+00> : vector<32x128xf32>
    %146 = tpu.matmul %143, %145, %cst_158 {dimension_numbers = #tpu.dot_dimension_numbers<[1], [0], [0], [1], [0, 0, 1, 1], [], []>} : vector<32x128xbf16>, vector<128x128xbf16>, vector<32x128xf32> -> vector<32x128xf32>
    %147 = arith.addf %140, %146 : vector<32x128xf32>
    %c0_159 = arith.constant 0 : index
    %c0_160 = arith.constant 0 : index
    %148 = vector.load %arg15[%c0_159, %c0_160] : memref<1x128xf32, #tpu.memory_space<vmem>>, vector<1x128xf32>
    %149 = vector.broadcast %148 : vector<1x128xf32> to vector<32x128xf32>
    %150 = arith.mulf %147, %149 : vector<32x128xf32>
    %c0_161 = arith.constant 0 : index
    %c0_162 = arith.constant 0 : index
    %151 = vector.load %arg16[%c0_161, %c0_162] : memref<1x128xf32, #tpu.memory_space<vmem>>, vector<1x128xf32>
    %152 = vector.broadcast %151 : vector<1x128xf32> to vector<32x128xf32>
    %153 = arith.addf %150, %152 : vector<32x128xf32>
    %cst_163 = arith.constant 0.000000e+00 : f32
    %154 = vector.broadcast %cst_163 : f32 to vector<32x128xf32>
    %155 = arith.maximumf %153, %154 : vector<32x128xf32>
    %156 = vector.shape_cast %155 : vector<32x128xf32> to vector<2x16x128xf32>
    %c0_164 = arith.constant 0 : index
    %c0_165 = arith.constant 0 : index
    %c0_166 = arith.constant 0 : index
    %157 = vector.load %arg22[%c0_164, %c0_165, %c0_166] : memref<2x24x128xf32, #tpu.memory_space<vmem>>, vector<2x16x128xf32>
    tpu.vector_store %arg22[%c0_164, %c0_165, %c0_166], %156 {strides = array<i32>} : memref<2x24x128xf32, #tpu.memory_space<vmem>>, vector<2x16x128xf32>,
    %c0_167 = arith.constant 0 : index
    %c0_168 = arith.constant 0 : index
    %c0_169 = arith.constant 0 : index
    %158 = vector.load %arg22[%c0_167, %c0_168, %c0_169] : memref<2x24x128xf32, #tpu.memory_space<vmem>>, vector<2x16x128xf32>
    %159 = arith.truncf %158 : vector<2x16x128xf32> to vector<2x16x128xbf16>
    %160 = vector.shape_cast %159 : vector<2x16x128xbf16> to vector<32x128xbf16>
    %c0_170 = arith.constant 0 : index
    %c0_171 = arith.constant 0 : index
    %c0_172 = arith.constant 0 : index
    %161 = vector.load %arg17[%c0_170, %c0_171, %c0_172] : memref<1x128x64xbf16, #tpu.memory_space<vmem>>, vector<1x128x64xbf16>
    %162 = vector.shape_cast %161 : vector<1x128x64xbf16> to vector<128x64xbf16>
    %cst_173 = arith.constant dense<0.000000e+00> : vector<32x64xf32>
    %163 = tpu.matmul %160, %162, %cst_173 {dimension_numbers = #tpu.dot_dimension_numbers<[1], [0], [0], [1], [0, 0, 1, 1], [], []>} : vector<32x128xbf16>, vector<128x64xbf16>, vector<32x64xf32> -> vector<32x64xf32>
    %c0_174 = arith.constant 0 : index
    %c0_175 = arith.constant 0 : index
    %164 = vector.load %arg18[%c0_174, %c0_175] : memref<1x64xf32, #tpu.memory_space<vmem>>, vector<1x64xf32>
    %165 = vector.broadcast %164 : vector<1x64xf32> to vector<32x64xf32>
    %166 = arith.mulf %163, %165 : vector<32x64xf32>
    %c0_176 = arith.constant 0 : index
    %c0_177 = arith.constant 0 : index
    %167 = vector.load %arg19[%c0_176, %c0_177] : memref<1x64xf32, #tpu.memory_space<vmem>>, vector<1x64xf32>
    %168 = vector.broadcast %167 : vector<1x64xf32> to vector<32x64xf32>
    %169 = arith.addf %166, %168 : vector<32x64xf32>
    %cst_178 = arith.constant 0.000000e+00 : f32
    %170 = vector.broadcast %cst_178 : f32 to vector<32x64xf32>
    %171 = arith.maximumf %169, %170 : vector<32x64xf32>
    %172 = vector.shape_cast %171 : vector<32x64xf32> to vector<2x16x64xf32>
    %173 = vector.extract_strided_slice %172 {offsets = [0, 0, 0], sizes = [2, 16, 16], strides = [1, 1, 1]} : vector<2x16x64xf32> to vector<2x16x16xf32>
    %c0_179 = arith.constant 0 : index
    %c0_180 = arith.constant 0 : index
    %c0_181 = arith.constant 0 : index
    %c0_182 = arith.constant 0 : index
    %174 = vector.load %arg20[%c0_179, %c0_180, %c0_181, %c0_182] : memref<2x4x16x16xf32, #tpu.memory_space<vmem>>, vector<2x1x16x16xf32>
    %175 = vector.shape_cast %174 : vector<2x1x16x16xf32> to vector<2x16x16xf32>
    %176 = vector.shape_cast %173 : vector<2x16x16xf32> to vector<2x1x16x16xf32>
    tpu.vector_store %arg20[%c0_179, %c0_180, %c0_181, %c0_182], %176 {strides = array<i32>} : memref<2x4x16x16xf32, #tpu.memory_space<vmem>>, vector<2x1x16x16xf32>,
    %177 = vector.extract_strided_slice %172 {offsets = [0, 0, 16], sizes = [2, 16, 16], strides = [1, 1, 1]} : vector<2x16x64xf32> to vector<2x16x16xf32>
    %c0_183 = arith.constant 0 : index
    %c1_184 = arith.constant 1 : index
    %c0_185 = arith.constant 0 : index
    %c0_186 = arith.constant 0 : index
    %178 = vector.load %arg20[%c0_183, %c1_184, %c0_185, %c0_186] : memref<2x4x16x16xf32, #tpu.memory_space<vmem>>, vector<2x1x16x16xf32>
    %179 = vector.shape_cast %178 : vector<2x1x16x16xf32> to vector<2x16x16xf32>
    %180 = vector.shape_cast %177 : vector<2x16x16xf32> to vector<2x1x16x16xf32>
    tpu.vector_store %arg20[%c0_183, %c1_184, %c0_185, %c0_186], %180 {strides = array<i32>} : memref<2x4x16x16xf32, #tpu.memory_space<vmem>>, vector<2x1x16x16xf32>,
    %181 = vector.extract_strided_slice %172 {offsets = [0, 0, 32], sizes = [2, 16, 16], strides = [1, 1, 1]} : vector<2x16x64xf32> to vector<2x16x16xf32>
    %c0_187 = arith.constant 0 : index
    %c2_188 = arith.constant 2 : index
    %c0_189 = arith.constant 0 : index
    %c0_190 = arith.constant 0 : index
    %182 = vector.load %arg20[%c0_187, %c2_188, %c0_189, %c0_190] : memref<2x4x16x16xf32, #tpu.memory_space<vmem>>, vector<2x1x16x16xf32>
    %183 = vector.shape_cast %182 : vector<2x1x16x16xf32> to vector<2x16x16xf32>
    %184 = vector.shape_cast %181 : vector<2x16x16xf32> to vector<2x1x16x16xf32>
    tpu.vector_store %arg20[%c0_187, %c2_188, %c0_189, %c0_190], %184 {strides = array<i32>} : memref<2x4x16x16xf32, #tpu.memory_space<vmem>>, vector<2x1x16x16xf32>,
    %185 = vector.extract_strided_slice %172 {offsets = [0, 0, 48], sizes = [2, 16, 16], strides = [1, 1, 1]} : vector<2x16x64xf32> to vector<2x16x16xf32>
    %c0_191 = arith.constant 0 : index
    %c3 = arith.constant 3 : index
    %c0_192 = arith.constant 0 : index
    %c0_193 = arith.constant 0 : index
    %186 = vector.load %arg20[%c0_191, %c3, %c0_192, %c0_193] : memref<2x4x16x16xf32, #tpu.memory_space<vmem>>, vector<2x1x16x16xf32>
    %187 = vector.shape_cast %186 : vector<2x1x16x16xf32> to vector<2x16x16xf32>
    %188 = vector.shape_cast %185 : vector<2x16x16xf32> to vector<2x1x16x16xf32>
    tpu.vector_store %arg20[%c0_191, %c3, %c0_192, %c0_193], %188 {strides = array<i32>} : memref<2x4x16x16xf32, #tpu.memory_space<vmem>>, vector<2x1x16x16xf32>,
    return
  }
  func.func @transform_0(%arg0: i32) -> (i32, i32, i32, i32) {
    %c0_i32 = arith.constant 0 : i32
    %c0_i32_0 = arith.constant 0 : i32
    %c0_i32_1 = arith.constant 0 : i32
    %c0_i32_2 = arith.constant 0 : i32
    return %arg0, %c0_i32, %c0_i32_0, %c0_i32_1 : i32, i32, i32, i32
  }
  func.func @transform_1(%arg0: i32) -> (i32, i32, i32) {
    %c0_i32 = arith.constant 0 : i32
    %c0_i32_0 = arith.constant 0 : i32
    %c0_i32_1 = arith.constant 0 : i32
    %c0_i32_2 = arith.constant 0 : i32
    return %c0_i32, %c0_i32_0, %c0_i32_1 : i32, i32, i32
  }
  func.func @transform_2(%arg0: i32) -> (i32, i32) {
    %c0_i32 = arith.constant 0 : i32
    %c0_i32_0 = arith.constant 0 : i32
    %c0_i32_1 = arith.constant 0 : i32
    return %c0_i32, %c0_i32_0 : i32, i32
  }
  func.func @transform_3(%arg0: i32) -> (i32, i32) {
    %c0_i32 = arith.constant 0 : i32
    %c0_i32_0 = arith.constant 0 : i32
    %c0_i32_1 = arith.constant 0 : i32
    return %c0_i32, %c0_i32_0 : i32, i32
  }
  func.func @transform_4(%arg0: i32) -> (i32, i32, i32) {
    %c0_i32 = arith.constant 0 : i32
    %c0_i32_0 = arith.constant 0 : i32
    %c0_i32_1 = arith.constant 0 : i32
    %c0_i32_2 = arith.constant 0 : i32
    return %c0_i32, %c0_i32_0, %c0_i32_1 : i32, i32, i32
  }
  func.func @transform_5(%arg0: i32) -> (i32, i32) {
    %c0_i32 = arith.constant 0 : i32
    %c0_i32_0 = arith.constant 0 : i32
    %c0_i32_1 = arith.constant 0 : i32
    return %c0_i32, %c0_i32_0 : i32, i32
  }
  func.func @transform_6(%arg0: i32) -> (i32, i32) {
    %c0_i32 = arith.constant 0 : i32
    %c0_i32_0 = arith.constant 0 : i32
    %c0_i32_1 = arith.constant 0 : i32
    return %c0_i32, %c0_i32_0 : i32, i32
  }
  func.func @transform_7(%arg0: i32) -> (i32, i32, i32) {
    %c0_i32 = arith.constant 0 : i32
    %c0_i32_0 = arith.constant 0 : i32
    %c0_i32_1 = arith.constant 0 : i32
    %c0_i32_2 = arith.constant 0 : i32
    return %c0_i32, %c0_i32_0, %c0_i32_1 : i32, i32, i32
  }
  func.func @transform_8(%arg0: i32) -> (i32, i32) {
    %c0_i32 = arith.constant 0 : i32
    %c0_i32_0 = arith.constant 0 : i32
    %c0_i32_1 = arith.constant 0 : i32
    return %c0_i32, %c0_i32_0 : i32, i32
  }
  func.func @transform_9(%arg0: i32) -> (i32, i32) {
    %c0_i32 = arith.constant 0 : i32
    %c0_i32_0 = arith.constant 0 : i32
    %c0_i32_1 = arith.constant 0 : i32
    return %c0_i32, %c0_i32_0 : i32, i32
  }
  func.func @transform_10(%arg0: i32) -> (i32, i32, i32) {
    %c0_i32 = arith.constant 0 : i32
    %c0_i32_0 = arith.constant 0 : i32
    %c0_i32_1 = arith.constant 0 : i32
    %c0_i32_2 = arith.constant 0 : i32
    return %c0_i32, %c0_i32_0, %c0_i32_1 : i32, i32, i32
  }
  func.func @transform_11(%arg0: i32) -> (i32, i32) {
    %c0_i32 = arith.constant 0 : i32
    %c0_i32_0 = arith.constant 0 : i32
    %c0_i32_1 = arith.constant 0 : i32
    return %c0_i32, %c0_i32_0 : i32, i32
  }
  func.func @transform_12(%arg0: i32) -> (i32, i32) {
    %c0_i32 = arith.constant 0 : i32
    %c0_i32_0 = arith.constant 0 : i32
    %c0_i32_1 = arith.constant 0 : i32
    return %c0_i32, %c0_i32_0 : i32, i32
  }
  func.func @transform_13(%arg0: i32) -> (i32, i32, i32) {
    %c0_i32 = arith.constant 0 : i32
    %c0_i32_0 = arith.constant 0 : i32
    %c0_i32_1 = arith.constant 0 : i32
    %c0_i32_2 = arith.constant 0 : i32
    return %c0_i32, %c0_i32_0, %c0_i32_1 : i32, i32, i32
  }
  func.func @transform_14(%arg0: i32) -> (i32, i32) {
    %c0_i32 = arith.constant 0 : i32
    %c0_i32_0 = arith.constant 0 : i32
    %c0_i32_1 = arith.constant 0 : i32
    return %c0_i32, %c0_i32_0 : i32, i32
  }
  func.func @transform_15(%arg0: i32) -> (i32, i32) {
    %c0_i32 = arith.constant 0 : i32
    %c0_i32_0 = arith.constant 0 : i32
    %c0_i32_1 = arith.constant 0 : i32
    return %c0_i32, %c0_i32_0 : i32, i32
  }
  func.func @transform_16(%arg0: i32) -> (i32, i32, i32) {
    %c0_i32 = arith.constant 0 : i32
    %c0_i32_0 = arith.constant 0 : i32
    %c0_i32_1 = arith.constant 0 : i32
    %c0_i32_2 = arith.constant 0 : i32
    return %c0_i32, %c0_i32_0, %c0_i32_1 : i32, i32, i32
  }
  func.func @transform_17(%arg0: i32) -> (i32, i32) {
    %c0_i32 = arith.constant 0 : i32
    %c0_i32_0 = arith.constant 0 : i32
    %c0_i32_1 = arith.constant 0 : i32
    return %c0_i32, %c0_i32_0 : i32, i32
  }
  func.func @transform_18(%arg0: i32) -> (i32, i32) {
    %c0_i32 = arith.constant 0 : i32
    %c0_i32_0 = arith.constant 0 : i32
    %c0_i32_1 = arith.constant 0 : i32
    return %c0_i32, %c0_i32_0 : i32, i32
  }
  func.func @transform_19(%arg0: i32) -> (i32, i32, i32, i32) {
    %c0_i32 = arith.constant 0 : i32
    %c0_i32_0 = arith.constant 0 : i32
    %c0_i32_1 = arith.constant 0 : i32
    %c0_i32_2 = arith.constant 0 : i32
    return %arg0, %c0_i32, %c0_i32_0, %c0_i32_1 : i32, i32, i32, i32
  }
}

</mosaic_0001>

<bundles_post_ra>
// kernel: tpu_custom_call.1
= control target key start
LH: loop header
LB: loop body
LE: loop exit
PB: predicated region body
PF: predicated region fallthrough
CT: control target
= control target key end

     0   :  { %s2778_s0 = inlined_call_operand.vmem [shape: f32[2,2,16,16], index: 0, kind: input, shape index: {}]   ;;  %s2779_s1 = inlined_call_operand.vmem [shape: bf16[1,32,128], index: 1, kind: input, shape index: {}]   ;;  %s2780_s2 = inlined_call_operand.vmem [shape: f32[1,128], index: 2, kind: input, shape index: {}]   ;;  %s2781_s3 = inlined_call_operand.vmem [shape: f32[1,128], index: 3, kind: input, shape index: {}]   ;;  %s2782_s4 = inlined_call_operand.hbm [shape: bf16[3,128,128], index: 4, kind: input, shape index: {}]   ;;  %s2783_s5 = inlined_call_operand.vmem [shape: f32[1,128], index: 5, kind: input, shape index: {}]   ;;  %s2784_s6 = inlined_call_operand.vmem [shape: f32[1,128], index: 6, kind: input, shape index: {}]   ;;  %s2785_s7 = inlined_call_operand.hbm [shape: bf16[3,128,128], index: 7, kind: input, shape index: {}]   ;;  %s2786_s8 = inlined_call_operand.vmem [shape: f32[1,128], index: 8, kind: input, shape index: {}]   ;;  %s2787_s9 = inlined_call_operand.vmem [shape: f32[1,128], index: 9, kind: input, shape index: {}]   ;;  %s2788_s10 = inlined_call_operand.hbm [shape: bf16[3,128,128], index: 10, kind: input, shape index: {}]   ;;  %s2789_s11 = inlined_call_operand.vmem [shape: f32[1,128], index: 11, kind: input, shape index: {}]   ;;  %s2790_s12 = inlined_call_operand.vmem [shape: f32[1,128], index: 12, kind: input, shape index: {}]   ;;  %s2791_s13 = inlined_call_operand.hbm [shape: bf16[3,128,128], index: 13, kind: input, shape index: {}]   ;;  %s2792_s14 = inlined_call_operand.vmem [shape: f32[1,128], index: 14, kind: input, shape index: {}]   ;;  %s2793_s15 = inlined_call_operand.vmem [shape: f32[1,128], index: 15, kind: input, shape index: {}]   ;;  %s2794_s16 = inlined_call_operand.vmem [shape: bf16[1,128,64], index: 16, kind: input, shape index: {}]   ;;  %s2795_s17 = inlined_call_operand.vmem [shape: f32[1,64], index: 17, kind: input, shape index: {}]   ;;  %s2796_s18 = inlined_call_operand.vmem [shape: f32[1,64], index: 18, kind: input, shape index: {}]   ;;  %s2797_s19 = inlined_call_operand.hbm [shape: f32[2,4,16,16], index: 19, kind: output, shape index: {}]  }
   0x1   :  { %2800 = sst [smem:[#allocation17_spill]] %s2778_s0 }
   0x2   :  { %2801 = sst [smem:[#allocation18_spill]] %s2779_s1 }
   0x3   :  { %2802 = sst [smem:[#allocation19_spill]] %s2780_s2 }
   0x4   :  { %2803 = sst [smem:[#allocation20_spill]] %s2781_s3 }
   0x5   :  { %24 = vsyncpa [#allocation5], 0 }
   0x6   :  { %25 = vsyncpa [#allocation8], 0 }
   0x7   :  { %26 = vsyncpa [#allocation11], 0 }
   0x8   :  { %27 = vsyncpa [#allocation6], 0  ;;  %s57_s20 = sshll.u32 %s2785_s7, 4  ;;  %s2519_s21 = smov [#allocation7]   ;;  %s58_s20 = int_to_ptr.hbm [resolvable:$true] %s57_s20 }
   0x9   :  { %s59_s1 = sshll.u32 %s2519_s21, 4  ;;  %s40_s23 = sshll.u32 %s2782_s4, 4  ;;  %s60_s1 = int_to_ptr.vmem [resolvable:$true] %s59_s1  ;;  %s41_s23 = int_to_ptr.hbm [resolvable:$true] %s40_s23 }
   0xa   :  { %s2520_s24 = smov 64   ;;  %s2521_s25 = smov 4  }
   0xb   :  { %65 = dma.hbm_to_vmem [thread:$0]  %s58_s20, 3072, %s60_s1, [#allocation8], %s2520_s24, %s2520_s24, %s2521_s25  }
   0xc   :  { %s2522_s3 = smov [#allocation4]   ;;  %s74_s29 = sshll.u32 %s2788_s10, 4  ;;  %s75_s29 = int_to_ptr.hbm [resolvable:$true] %s74_s29 }
   0xd   :  { %s42_s26 = sshll.u32 %s2522_s3, 4  ;;  %s91_s30 = sshll.u32 %s2791_s13, 4  ;;  %s43_s26 = int_to_ptr.vmem [resolvable:$true] %s42_s26  ;;  %s92_s30 = int_to_ptr.hbm [resolvable:$true] %s91_s30 }
   0xe   :  { %48 = dma.hbm_to_vmem [thread:$0]  %s41_s23, 3072, %s43_s26, [#allocation5], %s2520_s24, %s2520_s24, %s2521_s25  }
   0xf   :  { %s2523_s21 = smov [#allocation9]   ;;  %s2524_s4 = smov [#allocation10]  }
  0x10   :  { %s76_s22 = sshll.u32 %s2523_s21, 4  ;;  %s93_s20 = sshll.u32 %s2524_s4, 4  ;;  %s77_s22 = int_to_ptr.vmem [resolvable:$true] %s76_s22  ;;  %s94_s20 = int_to_ptr.vmem [resolvable:$true] %s93_s20 }
  0x11   :  { %82 = dma.hbm_to_vmem [thread:$0]  %s75_s29, 3072, %s77_s22, [#allocation8], %s2520_s24, %s2520_s24, %s2521_s25  }
  0x12   :  { %99 = dma.hbm_to_vmem [thread:$0]  %s92_s30, 3072, %s94_s20, [#allocation11], %s2520_s24, %s2520_s24, %s2521_s25  }
  0x13   :  { %2511 = dma.done.wait [#allocation5], 3072  }
  0x14   :  { %2512 = vsyncadd [#allocation5], 4294964224 }
  0x15   :  { %2513 = dma.done.wait [#allocation8], 6144  }
  0x16   :  { %2514 = vsyncadd [#allocation8], 4294961152 }
  0x17   :  { %2515 = dma.done.wait [#allocation11], 3072  }
  0x18   :  { %2516 = vsyncadd [#allocation11], 4294964224  ;;  %v2525_v0 = vmov 0.0   ;;  %s2804_s1 = sld [smem:[#allocation17_spill]]  ;;  %s2526_s24 = smov 16   ;;  %vm131_vm0 = vcmask 130048  }
  0x19   :  { %242 = vst [vmem:[#allocation3] sm:$0x1] %v2525_v0  ;;  %s2805_s20 = sld [smem:[#allocation18_spill]]  ;;  %vm157_vm1 = vcmask 261248   ;;  %v2268_v17 = vld [vmem:[#allocation4 + $0x78] sm:$0xff]  ;;  %vm196_vm2 = vcmask 261120  }
  0x1a   :  { %243 = vst [vmem:[#allocation3 + $0x18] sm:$0x1] %v2525_v0  ;;  %v2260_v18 = vld [vmem:[#allocation4 + $0x38] sm:$0xff]  ;;  %359 = vmatpush.bf16.msra.mxu1 %v2268_v17  ;;  %v2267_v32 = vld [vmem:[#allocation4 + $0x70] sm:$0xff]  ;;  %v2266_v33 = vld [vmem:[#allocation4 + $0x68] sm:$0xff]  ;;  %s2806_s25 = sld [smem:[#allocation19_spill]] }
  0x1b   :  { %244 = vst [vmem:[#allocation3 + $0x11] sm:$0x1] %v2525_v0  ;;  %v2276_v19 = vld [vmem:[#allocation4 + $0xb8] sm:$0xff]  ;;  %438 = vmatpush.bf16.msra.mxu2 %v2260_v18  ;;  %v2259_v34 = vld [vmem:[#allocation4 + $0x30] sm:$0xff]  ;;  %v2265_v36 = vld [vmem:[#allocation4 + $0x60] sm:$0xff]  ;;  %s2807_s27 = sld [smem:[#allocation20_spill]] }
  0x1c   :  { %245 = vst [vmem:[#allocation3 + $0x29] sm:$0x1] %v2525_v0  ;;  %542 = vmatpush.bf16.msra.mxu3 %v2276_v19  ;;  %v2275_v35 = vld [vmem:[#allocation4 + $0xb0] sm:$0xff]  ;;  %v2258_v37 = vld [vmem:[#allocation4 + $0x28] sm:$0xff]  ;;  %v2264_v39 = vld [vmem:[#allocation4 + $0x58] sm:$0xff]  ;;  %s2532_s10 = smov 8  }
  0x1d   :  { %587 = vst [vmem:[#allocation2 + $0x11] sm:$0x1] %v2525_v0  ;;  %v2274_v38 = vld [vmem:[#allocation4 + $0xa8] sm:$0xff]  ;;  %v2257_v40 = vld [vmem:[#allocation4 + $0x20] sm:$0xff]  ;;  %v2263_v42 = vld [vmem:[#allocation4 + $0x50] sm:$0xff] }
  0x1e   :  { %588 = vst [vmem:[#allocation2 + $0x29] sm:$0x1] %v2525_v0  ;;  %v1821_v1 = vld [vmem:[%s2804_s1 + $0x10] sm:$0xff]  ;;  %v1822_v3 = vld [vmem:[%s2804_s1 + $0x18] sm:$0xff]  ;;  %v127_v5 = vld [vmem:[%s2804_s1] sm:$0xff]  ;;  %360 = vmatpush.bf16.msra.mxu1 %v2267_v32 }
  0x1f   :  { %v1823_v2 = vld [vmem:[%s2804_s1 + $0x30] sm:$0xff]  ;;  %930 = vst [vmem:[#allocation3 + $0x12] sm:$0x3] %v2525_v0  ;;  %145 = vrot.lane.b32.xlu0 %v1821_v1, %s2526_s24  ;;  %v1824_v4 = vld [vmem:[%s2804_s1 + $0x38] sm:$0xff]  ;;  %v128_v6 = vld [vmem:[%s2804_s1 + $0x8] sm:$0xff]  ;;  %439 = vmatpush.bf16.msra.mxu2 %v2259_v34 }
  0x20   :  { %149 = vrot.lane.b32.xlu1 %v1823_v2, %s2526_s24  ;;  %931 = vst [vmem:[#allocation3 + $0x2a] sm:$0x3] %v2525_v0  ;;  %v129_v7 = vld [vmem:[%s2804_s1 + $0x20] sm:$0xff]  ;;  %v2252_v8 = vld [vmem:[%s2805_s20 + $0x8] sm:$0xff]  ;;  %543 = vmatpush.bf16.msra.mxu3 %v2275_v35  ;;  %v2256_v43 = vld [vmem:[#allocation4 + $0x18] sm:$0xff] }
  0x21   :  { %1273 = vst [vmem:[#allocation2 + $0x14] sm:$0xf] %v2525_v0  ;;  %v130_v9 = vld [vmem:[%s2804_s1 + $0x28] sm:$0xff]  ;;  %209 = vmatpush.bf16.msra.mxu0 %v2252_v8  ;;  %v2251_v10 = vld [vmem:[%s2805_s20] sm:$0xff]  ;;  %v2272_v44 = vld [vmem:[#allocation4 + $0x98] sm:$0xff]  ;;  %s2531_s20 = smov 128  }
  0x22   :  { %1274 = vst [vmem:[#allocation2 + $0x2c] sm:$0xf] %v2525_v0  ;;  %361 = vmatpush.bf16.msra.mxu1 %v2266_v33  ;;  %v2273_v41 = vld [vmem:[#allocation4 + $0xa0] sm:$0xff]  ;;  %v2262_v45 = vld [vmem:[#allocation4 + $0x48] sm:$0xff]  ;;  %v2255_v46 = vld [vmem:[#allocation4 + $0x10] sm:$0xff] }
  0x23   :  { %132 = vst.msk [vmem:[#allocation2] sm:$0xff] %vm131_vm0, %v127_v5  ;;  %440 = vmatpush.bf16.msra.mxu2 %v2258_v37  ;;  %v2271_v47 = vld [vmem:[#allocation4 + $0x90] sm:$0xff]  ;;  %v2261_v48 = vld [vmem:[#allocation4 + $0x40] sm:$0xff]  ;;  %v2254_v49 = vld [vmem:[#allocation4 + $0x8] sm:$0xff] }
  0x24   :  { %133 = vst.msk [vmem:[#allocation2 + $0x8] sm:$0xff] %vm131_vm0, %v128_v6  ;;  %544 = vmatpush.bf16.msra.mxu3 %v2274_v38  ;;  %v2270_v50 = vld [vmem:[#allocation4 + $0x88] sm:$0xff]  ;;  %v2253_v51 = vld [vmem:[#allocation4] sm:$0xff] }
  0x25   :  { %134 = vst.msk [vmem:[#allocation2 + $0x18] sm:$0xff] %vm131_vm0, %v129_v7  ;;  %210 = vmatpush.bf16.msra.mxu0 %v2251_v10  ;;  %v2269_v52 = vld [vmem:[#allocation4 + $0x80] sm:$0xff] }
  0x26   :  { %135 = vst.msk [vmem:[#allocation2 + $0x20] sm:$0xff] %vm131_vm0, %v130_v9  ;;  %362 = vmatpush.bf16.msra.mxu1 %v2265_v36  ;;  %v2379_v53 = vld [vmem:[%s2806_s25] ss:$0 sm:$0xff] }
  0x27   :  { %147 = vrot.lane.b32.xlu0 %v1822_v3, %s2526_s24  ;;  %441 = vmatpush.bf16.msra.mxu2 %v2257_v40  ;;  %v2380_v54 = vld [vmem:[%s2807_s27] ss:$0 sm:$0xff] }
  0x28   :  { %151 = vrot.lane.b32.xlu1 %v1824_v4, %s2526_s24  ;;  %545 = vmatpush.bf16.msra.mxu3 %v2273_v41 }
  0x2a   :  { %363 = vmatpush.bf16.msra.mxu1 %v2264_v39 }
  0x2b   :  { %442 = vmatpush.bf16.msra.mxu2 %v2256_v43 }
  0x2c   :  { %546 = vmatpush.bf16.msra.mxu3 %v2272_v44 }
  0x2e   :  { %364 = vmatpush.bf16.msra.mxu1 %v2263_v42 }
  0x2f   :  { %443 = vmatpush.bf16.msra.mxu2 %v2255_v46  ;;  %v2292_v46 = vld [vmem:[#allocation7 + $0x78] sm:$0xff] }
  0x30   :  { %547 = vmatpush.bf16.msra.mxu3 %v2271_v47  ;;  %702 = vmatpush.bf16.msrb.mxu0 %v2292_v46  ;;  %v2291_v47 = vld [vmem:[#allocation7 + $0x70] sm:$0xff] }
  0x32   :  { %365 = vmatpush.bf16.msra.mxu1 %v2262_v45 }
  0x33   :  { %444 = vmatpush.bf16.msra.mxu2 %v2254_v49  ;;  %v2284_v49 = vld [vmem:[#allocation7 + $0x38] sm:$0xff] }
  0x34   :  { %548 = vmatpush.bf16.msra.mxu3 %v2270_v50  ;;  %703 = vmatpush.bf16.msrb.mxu0 %v2291_v47  ;;  %v2290_v50 = vld [vmem:[#allocation7 + $0x68] sm:$0xff] }
  0x36   :  { %366 = vmatpush.bf16.msra.mxu1 %v2261_v48  ;;  %v2300_v48 = vld [vmem:[#allocation7 + $0xb8] sm:$0xff] }
  0x37   :  { %445 = vmatpush.bf16.msra.mxu2 %v2253_v51  ;;  %v2299_v51 = vld [vmem:[#allocation7 + $0xb0] sm:$0xff] }
  0x38   :  { %549 = vmatpush.bf16.msra.mxu3 %v2269_v52  ;;  %704 = vmatpush.bf16.msrb.mxu0 %v2290_v50  ;;  %v2283_v52 = vld [vmem:[#allocation7 + $0x30] sm:$0xff] }
  0x3a   :  { %781 = vmatpush.bf16.msrb.mxu1 %v2284_v49 }
  0x3b   :  { %885 = vmatpush.bf16.msrb.mxu2 %v2300_v48 }
  0x3e   :  { %782 = vmatpush.bf16.msrb.mxu1 %v2283_v52 }
  0x3f   :  { %886 = vmatpush.bf16.msrb.mxu2 %v2299_v51 }
  0x91   :  { %v146_v11 = vpop.permute.xlu0 %145 }
  0x92   :  { %v150_v12 = vpop.permute.xlu1 %149  ;;  %158 = vst.msk [vmem:[#allocation2] sm:$0xff] %vm157_vm1, %v146_v11 }
  0x93   :  { %160 = vst.msk [vmem:[#allocation2 + $0x18] sm:$0xff] %vm157_vm1, %v150_v12 }
  0x99   :  { %v162_v13 = vld [vmem:[#allocation2] sm:$0xff]  ;;  %v148_v14 = vpop.permute.xlu0 %147 }
  0x9a   :  { %585 = vst [vmem:[#allocation2] sm:$0x1] %v2525_v0  ;;  %v164_v15 = vld [vmem:[#allocation2 + $0x18] sm:$0xff]  ;;  %v152_v16 = vpop.permute.xlu1 %151  ;;  %v166_v20 = vpack.c.bf16 %v162_v13, %v162_v13 }
  0x9b   :  { %586 = vst [vmem:[#allocation2 + $0x18] sm:$0x1] %v2525_v0  ;;  %v168_v27 = vpack.c.bf16 %v164_v15, %v164_v15 }
  0x9c   :  { %159 = vst.msk [vmem:[#allocation2 + $0x8] sm:$0xff] %vm157_vm1, %v148_v14  ;;  %v178_v23 = vunpack.c.l.b16 %v166_v20 }
  0x9d   :  { %161 = vst.msk [vmem:[#allocation2 + $0x20] sm:$0xff] %vm157_vm1, %v152_v16  ;;  %v180_v29 = vunpack.c.l.b16 %v168_v27 }
  0xa3   :  { %v163_v21 = vld [vmem:[#allocation2 + $0x8] sm:$0xff] }
  0xa4   :  { %v167_v22 = vpack.c.bf16 %v163_v21, %v163_v21  ;;  %v165_v26 = vld [vmem:[#allocation2 + $0x20] sm:$0xff] }
  0xa5   :  { %v169_v28 = vpack.c.bf16 %v165_v26, %v165_v26 }
  0xa6   :  { %v179_v24 = vunpack.c.l.b16 %v167_v22 }
  0xa7   :  { %v181_v30 = vunpack.c.l.b16 %v169_v28 }
  0xa8   :  { %v182_v25 = vpack.c.b16 %v179_v24, %v178_v23 }
  0xa9   :  { %v183_v31 = vpack.c.b16 %v181_v30, %v180_v29 }
  0xaa   :  { %1833 = vmatmul.msk.bf16.vlgmr.msra.gmra.mxu0 %vm196_vm2, %v182_v25 }
  0xba   :  { %1834 = vmatmul.msk.bf16.gmra.mxu0 %vm196_vm2, %v183_v31 }
 0x127   :  { %v212_v55 = vpop.f32.mrf.mxu0 }
 0x128   :  { %v226_v56 = vmul.f32 %v2379_v53, %v212_v55  ;;  %v2282_v55 = vld [vmem:[#allocation7 + $0x28] sm:$0xff] }
 0x129   :  { %783 = vmatpush.bf16.msrb.mxu1 %v2282_v55 }
 0x12a   :  { %v234_v57 = vadd.f32 %v2380_v54, %v226_v56  ;;  %v2288_v56 = vld [vmem:[#allocation7 + $0x58] sm:$0xff] }
 0x12c   :  { %v238_v58 = vmax.f32 %v234_v57, 0.0  ;;  %v2297_v57 = vld [vmem:[#allocation7 + $0xa0] sm:$0xff] }
 0x12e   :  { %246 = vst [vmem:[#allocation3 + $0x1] sm:$0xff] %v238_v58  ;;  %v278_v63 = vpack.c.bf16 %v238_v58, %v238_v58  ;;  %v2281_v58 = vld [vmem:[#allocation7 + $0x20] sm:$0xff] }
 0x12f   :  { %v214_v59 = vpop.f32.mrf.mxu0  ;;  %784 = vmatpush.bf16.msrb.mxu1 %v2281_v58 }
 0x130   :  { %v227_v60 = vmul.f32 %v2379_v53, %v214_v59  ;;  %v303_v5 = vunpack.c.l.b16 %v278_v63  ;;  %v2287_v59 = vld [vmem:[#allocation7 + $0x50] sm:$0xff] }
 0x131   :  { %v2295_v63 = vld [vmem:[#allocation7 + $0x90] sm:$0xff] }
 0x132   :  { %v235_v61 = vadd.f32 %v2380_v54, %v227_v60  ;;  %v2296_v60 = vld [vmem:[#allocation7 + $0x98] sm:$0xff] }
 0x134   :  { %v239_v62 = vmax.f32 %v235_v61, 0.0  ;;  %v2280_v61 = vld [vmem:[#allocation7 + $0x18] sm:$0xff] }
 0x135   :  { %v250_v2 = vld [vmem:[#allocation3] sm:$0xff]  ;;  %785 = vmatpush.bf16.msrb.mxu1 %v2280_v61 }
 0x136   :  { %247 = vst [vmem:[#allocation3 + $0x9] sm:$0xff] %v239_v62  ;;  %v279_v1 = vpack.c.bf16 %v239_v62, %v239_v62  ;;  %v254_v9 = vpack.c.bf16 %v250_v2, %v250_v2  ;;  %v2286_v62 = vld [vmem:[#allocation7 + $0x48] sm:$0xff]  ;;  %v2285_v2 = vld [vmem:[#allocation7 + $0x40] sm:$0xff] }
 0x137   :  { %v217_v3 = vpop.f32.mrf.mxu0  ;;  %928 = vst [vmem:[#allocation3] sm:$0x3] %v2525_v0 }
 0x138   :  { %v228_v4 = vmul.f32 %v2379_v53, %v217_v3  ;;  %v304_v6 = vunpack.c.l.b16 %v279_v1  ;;  %v382_v18 = vunpack.c.l.b16 %v254_v9  ;;  %v2279_v1 = vld [vmem:[#allocation7 + $0x10] sm:$0xff]  ;;  %v2294_v3 = vld [vmem:[#allocation7 + $0x88] sm:$0xff] }
 0x139   :  { %786 = vmatpush.bf16.msrb.mxu1 %v2279_v1 }
 0x13a   :  { %v236_v7 = vadd.f32 %v2380_v54, %v228_v4  ;;  %v307_v8 = vpack.c.b16 %v304_v6, %v303_v5  ;;  %v2278_v4 = vld [vmem:[#allocation7 + $0x8] sm:$0xff]  ;;  %v2293_v6 = vld [vmem:[#allocation7 + $0x80] sm:$0xff] }
 0x13c   :  { %v240_v10 = vmax.f32 %v236_v7, 0.0  ;;  %367 = vmatmul.bf16.vlgmr.msra.gmra.mxu1 %v307_v8  ;;  %v2277_v7 = vld [vmem:[#allocation7] sm:$0xff] }
 0x13d   :  { %v251_v11 = vld [vmem:[#allocation3 + $0x8] sm:$0xff]  ;;  %787 = vmatpush.bf16.msrb.mxu1 %v2278_v4 }
 0x13e   :  { %v457_v12 = vld [vmem:[#allocation3 + $0x2] sm:$0xff]  ;;  %v458_v13 = vld [vmem:[#allocation3 + $0xa] sm:$0xff]  ;;  %248 = vst [vmem:[#allocation3 + $0x19] sm:$0xff] %v240_v10  ;;  %v255_v14 = vpack.c.bf16 %v251_v11, %v251_v11  ;;  %v280_v27 = vpack.c.bf16 %v240_v10, %v240_v10 }
 0x13f   :  { %v461_v15 = vpack.c.bf16 %v457_v12, %v457_v12  ;;  %v462_v16 = vpack.c.bf16 %v458_v13, %v458_v13  ;;  %v219_v17 = vpop.f32.mrf.mxu0  ;;  %v2381_v11 = vld [vmem:[%s2783_s5] ss:$0 sm:$0xff] }
 0x140   :  { %v229_v19 = vmul.f32 %v2379_v53, %v219_v17  ;;  %v383_v20 = vunpack.c.l.b16 %v255_v14  ;;  %v305_v30 = vunpack.c.l.b16 %v280_v27  ;;  %v2289_v53 = vld [vmem:[#allocation7 + $0x60] sm:$0xff] }
 0x141   :  { %v486_v21 = vunpack.c.l.b16 %v461_v15  ;;  %v487_v22 = vunpack.c.l.b16 %v462_v16  ;;  %705 = vmatpush.bf16.msrb.mxu0 %v2289_v53  ;;  %788 = vmatpush.bf16.msrb.mxu1 %v2277_v7  ;;  %v2382_v13 = vld [vmem:[%s2784_s6] ss:$0 sm:$0xff] }
 0x142   :  { %v237_v23 = vadd.f32 %v2380_v54, %v229_v19  ;;  %v386_v24 = vpack.c.b16 %v383_v20, %v382_v18  ;;  %v2298_v54 = vld [vmem:[#allocation7 + $0xa8] sm:$0xff] }
 0x143   :  { %v490_v25 = vpack.c.b16 %v487_v22, %v486_v21  ;;  %887 = vmatpush.bf16.msrb.mxu2 %v2298_v54 }
 0x144   :  { %v241_v26 = vmax.f32 %v237_v23, 0.0  ;;  %446 = vmatmul.bf16.vlgmr.msra.gmra.mxu2 %v386_v24 }
 0x145   :  { %550 = vmatmul.bf16.vlgmr.msra.gmra.mxu3 %v490_v25  ;;  %v252_v29 = vld [vmem:[#allocation3 + $0x18] sm:$0xff]  ;;  %706 = vmatpush.bf16.msrb.mxu0 %v2288_v56 }
 0x146   :  { %249 = vst [vmem:[#allocation3 + $0x21] sm:$0xff] %v241_v26  ;;  %v281_v28 = vpack.c.bf16 %v241_v26, %v241_v26  ;;  %v256_v33 = vpack.c.bf16 %v252_v29, %v252_v29 }
 0x147   :  { %929 = vst [vmem:[#allocation3 + $0x18] sm:$0x3] %v2525_v0  ;;  %888 = vmatpush.bf16.msrb.mxu2 %v2297_v57 }
 0x148   :  { %v306_v31 = vunpack.c.l.b16 %v281_v28  ;;  %v384_v40 = vunpack.c.l.b16 %v256_v33 }
 0x149   :  { %707 = vmatpush.bf16.msrb.mxu0 %v2287_v59 }
 0x14a   :  { %v308_v32 = vpack.c.b16 %v306_v31, %v305_v30 }
 0x14b   :  { %889 = vmatpush.bf16.msrb.mxu2 %v2296_v60 }
 0x14c   :  { %372 = vmatmul.bf16.gmra.mxu1 %v308_v32 }
 0x14d   :  { %v253_v34 = vld [vmem:[#allocation3 + $0x20] sm:$0xff]  ;;  %708 = vmatpush.bf16.msrb.mxu0 %v2286_v62 }
 0x14e   :  { %v459_v35 = vld [vmem:[#allocation3 + $0x1a] sm:$0xff]  ;;  %v460_v36 = vld [vmem:[#allocation3 + $0x22] sm:$0xff]  ;;  %v257_v37 = vpack.c.bf16 %v253_v34, %v253_v34 }
 0x14f   :  { %v463_v38 = vpack.c.bf16 %v459_v35, %v459_v35  ;;  %v464_v39 = vpack.c.bf16 %v460_v36, %v460_v36  ;;  %890 = vmatpush.bf16.msrb.mxu2 %v2295_v63 }
 0x150   :  { %v385_v41 = vunpack.c.l.b16 %v257_v37 }
 0x151   :  { %v488_v42 = vunpack.c.l.b16 %v463_v38  ;;  %v489_v43 = vunpack.c.l.b16 %v464_v39  ;;  %709 = vmatpush.bf16.msrb.mxu0 %v2285_v2 }
 0x152   :  { %v387_v44 = vpack.c.b16 %v385_v41, %v384_v40 }
 0x153   :  { %v491_v45 = vpack.c.b16 %v489_v43, %v488_v42  ;;  %891 = vmatpush.bf16.msrb.mxu2 %v2294_v3 }
 0x154   :  { %451 = vmatmul.bf16.gmra.mxu2 %v387_v44 }
 0x155   :  { %555 = vmatmul.bf16.gmra.mxu3 %v491_v45 }
 0x157   :  { %892 = vmatpush.bf16.msrb.mxu2 %v2293_v6 }
 0x1b9   :  { %v368_v5 = vpop.f32.mrf.mxu1 }
 0x1c1   :  { %v370_v14 = vpop.f32.mrf.mxu1 }
 0x1c7   :  { %v447_v8 = vpop.f32.mrf.mxu2 }
 0x1c8   :  { %v551_v9 = vpop.f32.mrf.mxu3  ;;  %v448_v10 = vadd.f32 %v447_v8, %v368_v5 }
 0x1c9   :  { %v373_v23 = vpop.f32.mrf.mxu1 }
 0x1ca   :  { %v561_v12 = vadd.f32 %v551_v9, %v448_v10 }
 0x1cc   :  { %v569_v15 = vmul.f32 %v2381_v11, %v561_v12 }
 0x1ce   :  { %v577_v16 = vadd.f32 %v2382_v13, %v569_v15 }
 0x1cf   :  { %v449_v17 = vpop.f32.mrf.mxu2 }
 0x1d0   :  { %v553_v18 = vpop.f32.mrf.mxu3  ;;  %v581_v19 = vmax.f32 %v577_v16, 0.0  ;;  %v450_v20 = vadd.f32 %v449_v17, %v370_v14  ;;  %v2316_v16 = vld [vmem:[#allocation9 + $0x78] sm:$0xff]  ;;  %v2315_v17 = vld [vmem:[#allocation9 + $0x70] sm:$0xff] }
 0x1d1   :  { %v375_v38 = vpop.f32.mrf.mxu1  ;;  %1045 = vmatpush.bf16.msrb.mxu3 %v2316_v16 }
 0x1d2   :  { %589 = vst [vmem:[#allocation2 + $0x1] sm:$0xff] %v581_v19  ;;  %v562_v21 = vadd.f32 %v553_v18, %v450_v20  ;;  %v621_v29 = vpack.c.bf16 %v581_v19, %v581_v19  ;;  %v2308_v18 = vld [vmem:[#allocation9 + $0x38] sm:$0xff]  ;;  %v2314_v20 = vld [vmem:[#allocation9 + $0x68] sm:$0xff] }
 0x1d3   :  { %v2324_v19 = vld [vmem:[#allocation9 + $0xb8] sm:$0xff]  ;;  %1124 = vmatpush.bf16.msra.mxu0 %v2308_v18 }
 0x1d4   :  { %v570_v22 = vmul.f32 %v2381_v11, %v562_v21  ;;  %v646_v33 = vunpack.c.l.b16 %v621_v29  ;;  %1228 = vmatpush.bf16.msra.mxu1 %v2324_v19  ;;  %v2307_v21 = vld [vmem:[#allocation9 + $0x30] sm:$0xff]  ;;  %v2304_v29 = vld [vmem:[#allocation9 + $0x18] sm:$0xff] }
 0x1d5   :  { %1046 = vmatpush.bf16.msrb.mxu3 %v2315_v17 }
 0x1d6   :  { %v578_v24 = vadd.f32 %v2382_v13, %v570_v22  ;;  %v2313_v22 = vld [vmem:[#allocation9 + $0x60] sm:$0xff] }
 0x1d7   :  { %v452_v25 = vpop.f32.mrf.mxu2  ;;  %1125 = vmatpush.bf16.msra.mxu0 %v2307_v21 }
 0x1d8   :  { %v556_v26 = vpop.f32.mrf.mxu3  ;;  %v582_v27 = vmax.f32 %v578_v24, 0.0  ;;  %v453_v28 = vadd.f32 %v452_v25, %v373_v23  ;;  %v2306_v23 = vld [vmem:[#allocation9 + $0x28] sm:$0xff]  ;;  %v2312_v25 = vld [vmem:[#allocation9 + $0x58] sm:$0xff] }
 0x1d9   :  { %v593_v35 = vld [vmem:[#allocation2] sm:$0xff]  ;;  %1047 = vmatpush.bf16.msrb.mxu3 %v2314_v20  ;;  %v2322_v24 = vld [vmem:[#allocation9 + $0xa8] sm:$0xff] }
 0x1da   :  { %590 = vst [vmem:[#allocation2 + $0x9] sm:$0xff] %v582_v27  ;;  %v563_v30 = vadd.f32 %v556_v26, %v453_v28  ;;  %v622_v31 = vpack.c.bf16 %v582_v27, %v582_v27  ;;  %v597_v40 = vpack.c.bf16 %v593_v35, %v593_v35  ;;  %v2305_v26 = vld [vmem:[#allocation9 + $0x20] sm:$0xff]  ;;  %v2311_v28 = vld [vmem:[#allocation9 + $0x50] sm:$0xff]  ;;  %v2302_v35 = vld [vmem:[#allocation9 + $0x8] sm:$0xff] }
 0x1db   :  { %1126 = vmatpush.bf16.msra.mxu0 %v2306_v23  ;;  %v2321_v27 = vld [vmem:[#allocation9 + $0xa0] sm:$0xff] }
 0x1dc   :  { %v571_v32 = vmul.f32 %v2381_v11, %v563_v30  ;;  %v647_v34 = vunpack.c.l.b16 %v622_v31  ;;  %v725_v51 = vunpack.c.l.b16 %v597_v40  ;;  %v2320_v30 = vld [vmem:[#allocation9 + $0x98] sm:$0xff]  ;;  %v2310_v31 = vld [vmem:[#allocation9 + $0x48] sm:$0xff]  ;;  %v2317_v40 = vld [vmem:[#allocation9 + $0x80] sm:$0xff] }
 0x1dd   :  { %1048 = vmatpush.bf16.msrb.mxu3 %v2313_v22 }
 0x1de   :  { %v579_v36 = vadd.f32 %v2382_v13, %v571_v32  ;;  %v650_v37 = vpack.c.b16 %v647_v34, %v646_v33  ;;  %v2303_v32 = vld [vmem:[#allocation9 + $0x10] sm:$0xff]  ;;  %v2309_v34 = vld [vmem:[#allocation9 + $0x40] sm:$0xff] }
 0x1df   :  { %v454_v39 = vpop.f32.mrf.mxu2  ;;  %1127 = vmatpush.bf16.msra.mxu0 %v2305_v26  ;;  %v2319_v33 = vld [vmem:[#allocation9 + $0x90] sm:$0xff] }
 0x1e0   :  { %v583_v41 = vmax.f32 %v579_v36, 0.0  ;;  %v455_v42 = vadd.f32 %v454_v39, %v375_v38  ;;  %710 = vmatmul.bf16.vlgmr.msrb.gmra.mxu0 %v650_v37  ;;  %v558_v43 = vpop.f32.mrf.mxu3  ;;  %v2318_v36 = vld [vmem:[#allocation9 + $0x88] sm:$0xff]  ;;  %v2301_v39 = vld [vmem:[#allocation9] sm:$0xff] }
 0x1e1   :  { %v594_v44 = vld [vmem:[#allocation2 + $0x8] sm:$0xff]  ;;  %1049 = vmatpush.bf16.msrb.mxu3 %v2312_v25 }
 0x1e2   :  { %v800_v45 = vld [vmem:[#allocation2 + $0x2] sm:$0xff]  ;;  %v801_v46 = vld [vmem:[#allocation2 + $0xa] sm:$0xff]  ;;  %591 = vst [vmem:[#allocation2 + $0x19] sm:$0xff] %v583_v41  ;;  %v564_v47 = vadd.f32 %v558_v43, %v455_v42  ;;  %v598_v48 = vpack.c.bf16 %v594_v44, %v594_v44  ;;  %v623_v60 = vpack.c.bf16 %v583_v41, %v583_v41  ;;  %v2383_v42 = vld [vmem:[%s2786_s8] ss:$0 sm:$0xff]  ;;  %s2527_s8 = smov 80  }
 0x1e3   :  { %v804_v49 = vpack.c.bf16 %v800_v45, %v800_v45  ;;  %v805_v50 = vpack.c.bf16 %v801_v46, %v801_v46  ;;  %1271 = vst [vmem:[#allocation2] sm:$0xf] %v2525_v0  ;;  %1128 = vmatpush.bf16.msra.mxu0 %v2304_v29  ;;  %v2384_v45 = vld [vmem:[%s2787_s9] ss:$0 sm:$0xff]  ;;  %s2528_s9 = smov 112  }
 0x1e4   :  { %v572_v52 = vmul.f32 %v2381_v11, %v564_v47  ;;  %v726_v53 = vunpack.c.l.b16 %v598_v48  ;;  %v648_v62 = vunpack.c.l.b16 %v623_v60 }
 0x1e5   :  { %v829_v54 = vunpack.c.l.b16 %v804_v49  ;;  %v830_v55 = vunpack.c.l.b16 %v805_v50  ;;  %1050 = vmatpush.bf16.msrb.mxu3 %v2311_v28 }
 0x1e6   :  { %v580_v56 = vadd.f32 %v2382_v13, %v572_v52  ;;  %v729_v57 = vpack.c.b16 %v726_v53, %v725_v51 }
 0x1e7   :  { %v833_v58 = vpack.c.b16 %v830_v55, %v829_v54  ;;  %1129 = vmatpush.bf16.msra.mxu0 %v2303_v32 }
 0x1e8   :  { %v584_v59 = vmax.f32 %v580_v56, 0.0  ;;  %789 = vmatmul.bf16.vlgmr.msrb.gmra.mxu1 %v729_v57 }
 0x1e9   :  { %893 = vmatmul.bf16.vlgmr.msrb.gmra.mxu2 %v833_v58  ;;  %v595_v1 = vld [vmem:[#allocation2 + $0x18] sm:$0xff]  ;;  %1051 = vmatpush.bf16.msrb.mxu3 %v2310_v31 }
 0x1ea   :  { %592 = vst [vmem:[#allocation2 + $0x21] sm:$0xff] %v584_v59  ;;  %v624_v61 = vpack.c.bf16 %v584_v59, %v584_v59  ;;  %v599_v3 = vpack.c.bf16 %v595_v1, %v595_v1 }
 0x1eb   :  { %1130 = vmatpush.bf16.msra.mxu0 %v2302_v35 }
 0x1ec   :  { %v649_v63 = vunpack.c.l.b16 %v624_v61  ;;  %v727_v10 = vunpack.c.l.b16 %v599_v3 }
 0x1ed   :  { %1052 = vmatpush.bf16.msrb.mxu3 %v2309_v34 }
 0x1ee   :  { %v651_v2 = vpack.c.b16 %v649_v63, %v648_v62 }
 0x1ef   :  { %1131 = vmatpush.bf16.msra.mxu0 %v2301_v39 }
 0x1f0   :  { %715 = vmatmul.bf16.gmra.mxu0 %v651_v2 }
 0x1f1   :  { %v596_v4 = vld [vmem:[#allocation2 + $0x20] sm:$0xff] }
 0x1f2   :  { %v802_v5 = vld [vmem:[#allocation2 + $0x1a] sm:$0xff]  ;;  %v803_v6 = vld [vmem:[#allocation2 + $0x22] sm:$0xff]  ;;  %v600_v7 = vpack.c.bf16 %v596_v4, %v596_v4 }
 0x1f3   :  { %v806_v8 = vpack.c.bf16 %v802_v5, %v802_v5  ;;  %v807_v9 = vpack.c.bf16 %v803_v6, %v803_v6  ;;  %1272 = vst [vmem:[#allocation2 + $0x18] sm:$0xf] %v2525_v0  ;;  %v2323_v0 = vld [vmem:[#allocation9 + $0xb0] sm:$0xff] }
 0x1f4   :  { %v728_v11 = vunpack.c.l.b16 %v600_v7  ;;  %1229 = vmatpush.bf16.msra.mxu1 %v2323_v0 }
 0x1f5   :  { %v831_v12 = vunpack.c.l.b16 %v806_v8  ;;  %v832_v13 = vunpack.c.l.b16 %v807_v9 }
 0x1f6   :  { %v730_v14 = vpack.c.b16 %v728_v11, %v727_v10 }
 0x1f7   :  { %v834_v15 = vpack.c.b16 %v832_v13, %v831_v12 }
 0x1f8   :  { %794 = vmatmul.bf16.gmra.mxu1 %v730_v14 }
 0x1f9   :  { %898 = vmatmul.bf16.gmra.mxu2 %v834_v15  ;;  %1230 = vmatpush.bf16.msra.mxu1 %v2322_v24 }
 0x1fd   :  { %1231 = vmatpush.bf16.msra.mxu1 %v2321_v27 }
 0x201   :  { %1232 = vmatpush.bf16.msra.mxu1 %v2320_v30 }
 0x205   :  { %1233 = vmatpush.bf16.msra.mxu1 %v2319_v33 }
 0x209   :  { %1234 = vmatpush.bf16.msra.mxu1 %v2318_v36 }
 0x20d   :  { %1235 = vmatpush.bf16.msra.mxu1 %v2317_v40 }
 0x25d   :  { %v711_v37 = vpop.f32.mrf.mxu0 }
 0x265   :  { %v790_v38 = vpop.f32.mrf.mxu1  ;;  %v713_v46 = vpop.f32.mrf.mxu0 }
 0x266   :  { %v791_v41 = vadd.f32 %v790_v38, %v711_v37 }
 0x26c   :  { %v894_v43 = vpop.f32.mrf.mxu2 }
 0x26d   :  { %v904_v44 = vadd.f32 %v894_v43, %v791_v41  ;;  %v792_v47 = vpop.f32.mrf.mxu1  ;;  %v716_v56 = vpop.f32.mrf.mxu0 }
 0x26e   :  { %v793_v51 = vadd.f32 %v792_v47, %v713_v46  ;;  %v2340_v47 = vld [vmem:[#allocation10 + $0x78] sm:$0xff] }
 0x26f   :  { %v912_v48 = vmul.f32 %v2383_v42, %v904_v44  ;;  %1388 = vmatpush.bf16.msra.mxu2 %v2340_v47 }
 0x271   :  { %v920_v49 = vadd.f32 %v2384_v45, %v912_v48  ;;  %v2339_v48 = vld [vmem:[#allocation10 + $0x70] sm:$0xff] }
 0x273   :  { %v924_v50 = vmax.f32 %v920_v49, 0.0  ;;  %1389 = vmatpush.bf16.msra.mxu2 %v2339_v48  ;;  %v2332_v49 = vld [vmem:[#allocation10 + $0x38] sm:$0xff] }
 0x274   :  { %v896_v52 = vpop.f32.mrf.mxu2  ;;  %1467 = vmatpush.bf16.msra.mxu3 %v2332_v49 }
 0x275   :  { %932 = vst [vmem:[#allocation3 + $0x2] sm:$0xff] %v924_v50  ;;  %v905_v53 = vadd.f32 %v896_v52, %v793_v51  ;;  %v795_v54 = vpop.f32.mrf.mxu1  ;;  %v964_v60 = vpack.c.bf16 %v924_v50, %v924_v50  ;;  %v718_v8 = vpop.f32.mrf.mxu0  ;;  %v2348_v50 = vld [vmem:[#allocation10 + $0xb8] sm:$0xff]  ;;  %v2338_v51 = vld [vmem:[#allocation10 + $0x68] sm:$0xff]  ;;  %v2331_v52 = vld [vmem:[#allocation10 + $0x30] sm:$0xff] }
 0x276   :  { %v796_v59 = vadd.f32 %v795_v54, %v716_v56  ;;  %1571 = vmatpush.bf16.msrb.mxu0 %v2348_v50  ;;  %v2337_v54 = vld [vmem:[#allocation10 + $0x60] sm:$0xff]  ;;  %v2346_v56 = vld [vmem:[#allocation10 + $0xa8] sm:$0xff] }
 0x277   :  { %v913_v55 = vmul.f32 %v2383_v42, %v905_v53  ;;  %v989_v2 = vunpack.c.l.b16 %v964_v60  ;;  %1390 = vmatpush.bf16.msra.mxu2 %v2338_v51  ;;  %v2347_v53 = vld [vmem:[#allocation10 + $0xb0] sm:$0xff] }
 0x278   :  { %1468 = vmatpush.bf16.msra.mxu3 %v2331_v52  ;;  %v2335_v60 = vld [vmem:[#allocation10 + $0x50] sm:$0xff] }
 0x279   :  { %v921_v57 = vadd.f32 %v2384_v45, %v913_v55  ;;  %v2330_v55 = vld [vmem:[#allocation10 + $0x28] sm:$0xff] }
 0x27a   :  { %1572 = vmatpush.bf16.msrb.mxu0 %v2347_v53 }
 0x27b   :  { %v925_v58 = vmax.f32 %v921_v57, 0.0  ;;  %1391 = vmatpush.bf16.msra.mxu2 %v2337_v54  ;;  %v2336_v57 = vld [vmem:[#allocation10 + $0x58] sm:$0xff] }
 0x27c   :  { %v899_v61 = vpop.f32.mrf.mxu2  ;;  %v936_v4 = vld [vmem:[#allocation3] sm:$0xff]  ;;  %1469 = vmatpush.bf16.msra.mxu3 %v2330_v55 }
 0x27d   :  { %933 = vst [vmem:[#allocation3 + $0xa] sm:$0xff] %v925_v58  ;;  %v906_v62 = vadd.f32 %v899_v61, %v796_v59  ;;  %v965_v63 = vpack.c.bf16 %v925_v58, %v925_v58  ;;  %v797_v5 = vpop.f32.mrf.mxu1  ;;  %v940_v9 = vpack.c.bf16 %v936_v4, %v936_v4  ;;  %v2329_v58 = vld [vmem:[#allocation10 + $0x20] sm:$0xff]  ;;  %v2328_v61 = vld [vmem:[#allocation10 + $0x18] sm:$0xff]  ;;  %v2326_v4 = vld [vmem:[#allocation10 + $0x8] sm:$0xff] }
 0x27e   :  { %v798_v11 = vadd.f32 %v797_v5, %v718_v8  ;;  %1573 = vmatpush.bf16.msrb.mxu0 %v2346_v56  ;;  %v2345_v59 = vld [vmem:[#allocation10 + $0xa0] sm:$0xff]  ;;  %v2342_v5 = vld [vmem:[#allocation10 + $0x88] sm:$0xff] }
 0x27f   :  { %v914_v1 = vmul.f32 %v2383_v42, %v906_v62  ;;  %v990_v3 = vunpack.c.l.b16 %v965_v63  ;;  %v1068_v20 = vunpack.c.l.b16 %v940_v9  ;;  %1392 = vmatpush.bf16.msra.mxu2 %v2336_v57  ;;  %v2344_v62 = vld [vmem:[#allocation10 + $0x98] sm:$0xff]  ;;  %v2334_v63 = vld [vmem:[#allocation10 + $0x48] sm:$0xff] }
 0x280   :  { %1470 = vmatpush.bf16.msra.mxu3 %v2329_v58 }
 0x281   :  { %v922_v6 = vadd.f32 %v2384_v45, %v914_v1  ;;  %v993_v7 = vpack.c.b16 %v990_v3, %v989_v2  ;;  %v2327_v1 = vld [vmem:[#allocation10 + $0x10] sm:$0xff]  ;;  %v2333_v3 = vld [vmem:[#allocation10 + $0x40] sm:$0xff] }
 0x282   :  { %1574 = vmatpush.bf16.msrb.mxu0 %v2345_v59  ;;  %v2343_v2 = vld [vmem:[#allocation10 + $0x90] sm:$0xff] }
 0x283   :  { %v926_v10 = vmax.f32 %v922_v6, 0.0  ;;  %1053 = vmatmul.bf16.vlgmr.msrb.gmra.mxu3 %v993_v7  ;;  %1393 = vmatpush.bf16.msra.mxu2 %v2335_v60  ;;  %v2325_v6 = vld [vmem:[#allocation10] sm:$0xff] }
 0x284   :  { %v901_v12 = vpop.f32.mrf.mxu2  ;;  %v937_v13 = vld [vmem:[#allocation3 + $0x8] sm:$0xff]  ;;  %1471 = vmatpush.bf16.msra.mxu3 %v2328_v61  ;;  %v2341_v7 = vld [vmem:[#allocation10 + $0x80] sm:$0xff] }
 0x285   :  { %v1143_v14 = vld [vmem:[#allocation3 + $0x4] sm:$0xff]  ;;  %v1144_v15 = vld [vmem:[#allocation3 + $0xc] sm:$0xff]  ;;  %934 = vst [vmem:[#allocation3 + $0x1a] sm:$0xff] %v926_v10  ;;  %v907_v16 = vadd.f32 %v901_v12, %v798_v11  ;;  %v941_v17 = vpack.c.bf16 %v937_v13, %v937_v13  ;;  %v966_v28 = vpack.c.bf16 %v926_v10, %v926_v10 }
 0x286   :  { %v1147_v18 = vpack.c.bf16 %v1143_v14, %v1143_v14  ;;  %v1148_v19 = vpack.c.bf16 %v1144_v15, %v1144_v15  ;;  %1575 = vmatpush.bf16.msrb.mxu0 %v2344_v62  ;;  %v2385_v12 = vld [vmem:[%s2789_s11] ss:$0 sm:$0xff] }
 0x287   :  { %v915_v21 = vmul.f32 %v2383_v42, %v907_v16  ;;  %v1069_v0 = vunpack.c.l.b16 %v941_v17  ;;  %v991_v30 = vunpack.c.l.b16 %v966_v28  ;;  %1394 = vmatpush.bf16.msra.mxu2 %v2334_v63  ;;  %v2386_v14 = vld [vmem:[%s2790_s12] ss:$0 sm:$0xff]  ;;  %s1806_s12 = sshll.u32 %s2797_s19, 4  ;;  %s1807_s12 = int_to_ptr.hbm [resolvable:$true] %s1806_s12 }
 0x288   :  { %v1172_v22 = vunpack.c.l.b16 %v1147_v18  ;;  %v1173_v23 = vunpack.c.l.b16 %v1148_v19  ;;  %1472 = vmatpush.bf16.msra.mxu3 %v2327_v1 }
 0x289   :  { %v923_v24 = vadd.f32 %v2384_v45, %v915_v21  ;;  %v1072_v25 = vpack.c.b16 %v1069_v0, %v1068_v20 }
 0x28a   :  { %v1176_v26 = vpack.c.b16 %v1173_v23, %v1172_v22  ;;  %1576 = vmatpush.bf16.msrb.mxu0 %v2343_v2 }
 0x28b   :  { %v927_v27 = vmax.f32 %v923_v24, 0.0  ;;  %1132 = vmatmul.bf16.vlgmr.msra.gmra.mxu0 %v1072_v25  ;;  %1395 = vmatpush.bf16.msra.mxu2 %v2333_v3 }
 0x28c   :  { %1236 = vmatmul.bf16.vlgmr.msra.gmra.mxu1 %v1176_v26  ;;  %v938_v32 = vld [vmem:[#allocation3 + $0x18] sm:$0xff]  ;;  %1473 = vmatpush.bf16.msra.mxu3 %v2326_v4 }
 0x28d   :  { %935 = vst [vmem:[#allocation3 + $0x22] sm:$0xff] %v927_v27  ;;  %v967_v29 = vpack.c.bf16 %v927_v27, %v927_v27  ;;  %v942_v34 = vpack.c.bf16 %v938_v32, %v938_v32 }
 0x28e   :  { %1577 = vmatpush.bf16.msrb.mxu0 %v2342_v5 }
 0x28f   :  { %v992_v31 = vunpack.c.l.b16 %v967_v29  ;;  %v1070_v41 = vunpack.c.l.b16 %v942_v34 }
 0x290   :  { %1474 = vmatpush.bf16.msra.mxu3 %v2325_v6 }
 0x291   :  { %v994_v33 = vpack.c.b16 %v992_v31, %v991_v30 }
 0x292   :  { %1578 = vmatpush.bf16.msrb.mxu0 %v2341_v7 }
 0x293   :  { %1058 = vmatmul.bf16.gmra.mxu3 %v994_v33 }
 0x294   :  { %v939_v35 = vld [vmem:[#allocation3 + $0x20] sm:$0xff] }
 0x295   :  { %v1145_v36 = vld [vmem:[#allocation3 + $0x1c] sm:$0xff]  ;;  %v1146_v37 = vld [vmem:[#allocation3 + $0x24] sm:$0xff]  ;;  %v943_v38 = vpack.c.bf16 %v939_v35, %v939_v35 }
 0x296   :  { %v1149_v39 = vpack.c.bf16 %v1145_v36, %v1145_v36  ;;  %v1150_v40 = vpack.c.bf16 %v1146_v37, %v1146_v37 }
 0x297   :  { %v1071_v42 = vunpack.c.l.b16 %v943_v38 }
 0x298   :  { %v1174_v43 = vunpack.c.l.b16 %v1149_v39  ;;  %v1175_v44 = vunpack.c.l.b16 %v1150_v40 }
 0x299   :  { %v1073_v45 = vpack.c.b16 %v1071_v42, %v1070_v41 }
 0x29a   :  { %v1177_v46 = vpack.c.b16 %v1175_v44, %v1174_v43 }
 0x29b   :  { %1137 = vmatmul.bf16.gmra.mxu0 %v1073_v45 }
 0x29c   :  { %1241 = vmatmul.bf16.gmra.mxu1 %v1177_v46 }
 0x306   :  { %v1054_v8 = vpop.f32.mrf.mxu3 }
 0x308   :  { %v1133_v9 = vpop.f32.mrf.mxu0 }
 0x309   :  { %v1237_v10 = vpop.f32.mrf.mxu1  ;;  %v1134_v11 = vadd.f32 %v1133_v9, %v1054_v8 }
 0x30b   :  { %v1247_v13 = vadd.f32 %v1237_v10, %v1134_v11  ;;  %v2356_v10 = vld [vmem:[%s2794_s16 + $0x38] sm:$0xff]  ;;  %v2355_v11 = vld [vmem:[%s2794_s16 + $0x30] sm:$0xff] }
 0x30c   :  { %1702 = vmatpush.bf16.msrb.mxu1 %v2356_v10  ;;  %2357 = vmatpush.bf16.msrb.mxu2 %v2356_v10 }
 0x30d   :  { %v1255_v15 = vmul.f32 %v2385_v12, %v1247_v13  ;;  %v2353_v13 = vld [vmem:[%s2794_s16 + $0x20] sm:$0xff] }
 0x30e   :  { %v1056_v16 = vpop.f32.mrf.mxu3 }
 0x30f   :  { %v1263_v17 = vadd.f32 %v2386_v14, %v1255_v15  ;;  %v2351_v15 = vld [vmem:[%s2794_s16 + $0x10] sm:$0xff] }
 0x310   :  { %v1135_v18 = vpop.f32.mrf.mxu0  ;;  %1703 = vmatpush.bf16.msrb.mxu1 %v2355_v11  ;;  %2358 = vmatpush.bf16.msrb.mxu2 %v2355_v11 }
 0x311   :  { %v1239_v19 = vpop.f32.mrf.mxu1  ;;  %v1267_v20 = vmax.f32 %v1263_v17, 0.0  ;;  %v1136_v21 = vadd.f32 %v1135_v18, %v1056_v16  ;;  %v2350_v16 = vld [vmem:[%s2794_s16 + $0x8] sm:$0xff]  ;;  %v2349_v17 = vld [vmem:[%s2794_s16] sm:$0xff] }
 0x313   :  { %1275 = vst [vmem:[#allocation2 + $0x4] sm:$0xff] %v1267_v20  ;;  %v1248_v0 = vadd.f32 %v1239_v19, %v1136_v21  ;;  %v1307_v29 = vpack.c.bf16 %v1267_v20, %v1267_v20 }
 0x315   :  { %v1256_v22 = vmul.f32 %v2385_v12, %v1248_v0  ;;  %v1332_v33 = vunpack.c.l.b16 %v1307_v29  ;;  %v2387_v0 = vld [vmem:[%s2792_s14] ss:$0 sm:$0xff] }
 0x316   :  { %v1059_v23 = vpop.f32.mrf.mxu3 }
 0x317   :  { %v1264_v24 = vadd.f32 %v2386_v14, %v1256_v22 }
 0x318   :  { %v1138_v25 = vpop.f32.mrf.mxu0 }
 0x319   :  { %v1242_v26 = vpop.f32.mrf.mxu1  ;;  %v1268_v27 = vmax.f32 %v1264_v24, 0.0  ;;  %v1139_v28 = vadd.f32 %v1138_v25, %v1059_v23  ;;  %v2388_v23 = vld [vmem:[%s2793_s15] ss:$0 sm:$0xff] }
 0x31a   :  { %v1279_v35 = vld [vmem:[#allocation2] sm:$0xff] }
 0x31b   :  { %1276 = vst [vmem:[#allocation2 + $0xc] sm:$0xff] %v1268_v27  ;;  %v1249_v30 = vadd.f32 %v1242_v26, %v1139_v28  ;;  %v1308_v31 = vpack.c.bf16 %v1268_v27, %v1268_v27  ;;  %v1283_v42 = vpack.c.bf16 %v1279_v35, %v1279_v35 }
 0x31d   :  { %v1257_v32 = vmul.f32 %v2385_v12, %v1249_v30  ;;  %v1333_v34 = vunpack.c.l.b16 %v1308_v31  ;;  %v1411_v50 = vunpack.c.l.b16 %v1283_v42 }
 0x31e   :  { %v1061_v39 = vpop.f32.mrf.mxu3 }
 0x31f   :  { %v1265_v36 = vadd.f32 %v2386_v14, %v1257_v32  ;;  %v1336_v37 = vpack.c.b16 %v1333_v34, %v1332_v33 }
 0x320   :  { %v1140_v38 = vpop.f32.mrf.mxu0 }
 0x321   :  { %v1269_v40 = vmax.f32 %v1265_v36, 0.0  ;;  %v1141_v41 = vadd.f32 %v1140_v38, %v1061_v39  ;;  %1396 = vmatmul.bf16.vlgmr.msra.gmra.mxu2 %v1336_v37  ;;  %v1244_v43 = vpop.f32.mrf.mxu1 }
 0x322   :  { %v1280_v44 = vld [vmem:[#allocation2 + $0x8] sm:$0xff]  ;;  %v1487_v45 = vld [vmem:[#allocation2 + $0x10] sm:$0xff] }
 0x323   :  { %1277 = vst [vmem:[#allocation2 + $0x1c] sm:$0xff] %v1269_v40  ;;  %v1250_v46 = vadd.f32 %v1244_v43, %v1141_v41  ;;  %v1284_v47 = vpack.c.bf16 %v1280_v44, %v1280_v44  ;;  %v1491_v48 = vpack.c.bf16 %v1487_v45, %v1487_v45  ;;  %v1309_v57 = vpack.c.bf16 %v1269_v40, %v1269_v40 }
 0x325   :  { %v1258_v49 = vmul.f32 %v2385_v12, %v1250_v46  ;;  %v1412_v51 = vunpack.c.l.b16 %v1284_v47  ;;  %v1516_v52 = vunpack.c.l.b16 %v1491_v48  ;;  %v1334_v59 = vunpack.c.l.b16 %v1309_v57  ;;  %v2354_v12 = vld [vmem:[%s2794_s16 + $0x28] sm:$0xff] }
 0x326   :  { %1704 = vmatpush.bf16.msrb.mxu1 %v2354_v12  ;;  %2359 = vmatpush.bf16.msrb.mxu2 %v2354_v12 }
 0x327   :  { %v1266_v53 = vadd.f32 %v2386_v14, %v1258_v49  ;;  %v1415_v54 = vpack.c.b16 %v1412_v51, %v1411_v50  ;;  %v1519_v55 = vpack.c.b16 %v1516_v52, %v1412_v51  ;;  %v2352_v14 = vld [vmem:[%s2794_s16 + $0x18] sm:$0xff] }
 0x329   :  { %v1270_v56 = vmax.f32 %v1266_v53, 0.0  ;;  %1475 = vmatmul.bf16.vlgmr.msra.gmra.mxu3 %v1415_v54  ;;  %1579 = vmatmul.bf16.vlgmr.msrb.gmra.mxu0 %v1519_v55 }
 0x32a   :  { %v1281_v61 = vld [vmem:[#allocation2 + $0x18] sm:$0xff]  ;;  %1705 = vmatpush.bf16.msrb.mxu1 %v2353_v13  ;;  %2360 = vmatpush.bf16.msrb.mxu2 %v2353_v13 }
 0x32b   :  { %1278 = vst [vmem:[#allocation2 + $0x24] sm:$0xff] %v1270_v56  ;;  %v1310_v58 = vpack.c.bf16 %v1270_v56, %v1270_v56  ;;  %v1285_v63 = vpack.c.bf16 %v1281_v61, %v1281_v61  ;;  %v2389_v61 = vld [vmem:[%s2795_s17] ss:$0 sm:$0xff]  ;;  %s2529_s17 = smov 96  }
 0x32d   :  { %v1335_v60 = vunpack.c.l.b16 %v1310_v58  ;;  %v1413_v5 = vunpack.c.l.b16 %v1285_v63 }
 0x32e   :  { %1706 = vmatpush.bf16.msrb.mxu1 %v2352_v14  ;;  %2361 = vmatpush.bf16.msrb.mxu2 %v2352_v14 }
 0x32f   :  { %v1337_v62 = vpack.c.b16 %v1335_v60, %v1334_v59 }
 0x331   :  { %1401 = vmatmul.bf16.gmra.mxu2 %v1337_v62  ;;  %v2390_v62 = vld [vmem:[%s2796_s18] ss:$0 sm:$0xff]  ;;  %s2530_s18 = smov [#allocation12]  }
 0x332   :  { %v1282_v1 = vld [vmem:[#allocation2 + $0x20] sm:$0xff]  ;;  %v1489_v2 = vld [vmem:[#allocation2 + $0x28] sm:$0xff]  ;;  %1707 = vmatpush.bf16.msrb.mxu1 %v2351_v15  ;;  %2362 = vmatpush.bf16.msrb.mxu2 %v2351_v15  ;;  %s1804_s22 = sshll.u32 %s2530_s18, 4  ;;  %s1805_s22 = int_to_ptr.vmem [resolvable:$true] %s1804_s22 }
 0x333   :  { %v1286_v3 = vpack.c.bf16 %v1282_v1, %v1282_v1  ;;  %v1493_v4 = vpack.c.bf16 %v1489_v2, %v1489_v2 }
 0x335   :  { %v1414_v6 = vunpack.c.l.b16 %v1286_v3  ;;  %v1518_v7 = vunpack.c.l.b16 %v1493_v4 }
 0x336   :  { %1708 = vmatpush.bf16.msrb.mxu1 %v2350_v16  ;;  %2363 = vmatpush.bf16.msrb.mxu2 %v2350_v16 }
 0x337   :  { %v1416_v8 = vpack.c.b16 %v1414_v6, %v1413_v5  ;;  %v1520_v9 = vpack.c.b16 %v1518_v7, %v1414_v6 }
 0x339   :  { %1480 = vmatmul.bf16.gmra.mxu3 %v1416_v8  ;;  %1584 = vmatmul.bf16.gmra.mxu0 %v1520_v9 }
 0x33a   :  { %1709 = vmatpush.bf16.msrb.mxu1 %v2349_v17  ;;  %2364 = vmatpush.bf16.msrb.mxu2 %v2349_v17 }
 0x3a4   :  { %v1397_v18 = vpop.f32.mrf.mxu2 }
 0x3a6   :  { %v1580_v19 = vpop.f32.mrf.mxu0 }
 0x3ac   :  { %v1476_v20 = vpop.f32.mrf.mxu3  ;;  %v1399_v24 = vpop.f32.mrf.mxu2 }
 0x3ad   :  { %v1477_v21 = vadd.f32 %v1476_v20, %v1397_v18 }
 0x3ae   :  { %v1582_v26 = vpop.f32.mrf.mxu0 }
 0x3af   :  { %v1590_v22 = vadd.f32 %v1580_v19, %v1477_v21 }
 0x3b1   :  { %v1598_v25 = vmul.f32 %v2387_v0, %v1590_v22 }
 0x3b3   :  { %v1606_v27 = vadd.f32 %v2388_v23, %v1598_v25 }
 0x3b4   :  { %v1478_v28 = vpop.f32.mrf.mxu3  ;;  %v1402_v33 = vpop.f32.mrf.mxu2 }
 0x3b5   :  { %v1610_v29 = vmax.f32 %v1606_v27, 0.0  ;;  %v1479_v30 = vadd.f32 %v1478_v28, %v1399_v24 }
 0x3b6   :  { %v1585_v35 = vpop.f32.mrf.mxu0 }
 0x3b7   :  { %1614 = vst [vmem:[#allocation3] sm:$0xff] %v1610_v29  ;;  %v1591_v31 = vadd.f32 %v1582_v26, %v1479_v30  ;;  %v1622_v39 = vpack.c.bf16 %v1610_v29, %v1610_v29 }
 0x3b9   :  { %v1599_v32 = vmul.f32 %v2387_v0, %v1591_v31  ;;  %v1646_v43 = vunpack.c.l.b16 %v1622_v39 }
 0x3bb   :  { %v1607_v34 = vadd.f32 %v2388_v23, %v1599_v32 }
 0x3bc   :  { %v1481_v36 = vpop.f32.mrf.mxu3  ;;  %v1404_v47 = vpop.f32.mrf.mxu2 }
 0x3bd   :  { %v1611_v37 = vmax.f32 %v1607_v34, 0.0  ;;  %v1482_v38 = vadd.f32 %v1481_v36, %v1402_v33 }
 0x3be   :  { %v1587_v51 = vpop.f32.mrf.mxu0 }
 0x3bf   :  { %1615 = vst [vmem:[#allocation3 + $0x8] sm:$0xff] %v1611_v37  ;;  %v1592_v40 = vadd.f32 %v1585_v35, %v1482_v38  ;;  %v1623_v41 = vpack.c.bf16 %v1611_v37, %v1611_v37 }
 0x3c1   :  { %v1600_v42 = vmul.f32 %v2387_v0, %v1592_v40  ;;  %v1647_v44 = vunpack.c.l.b16 %v1623_v41 }
 0x3c3   :  { %v1608_v45 = vadd.f32 %v2388_v23, %v1600_v42  ;;  %v1650_v46 = vpack.c.b16 %v1647_v44, %v1646_v43 }
 0x3c4   :  { %v1483_v48 = vpop.f32.mrf.mxu3 }
 0x3c5   :  { %v1612_v49 = vmax.f32 %v1608_v45, 0.0  ;;  %v1484_v50 = vadd.f32 %v1483_v48, %v1404_v47  ;;  %1710 = vmatmul.bf16.vlgmr.msrb.gmra.mxu1 %v1650_v46 }
 0x3c7   :  { %1616 = vst [vmem:[#allocation3 + $0x18] sm:$0xff] %v1612_v49  ;;  %v1593_v52 = vadd.f32 %v1587_v51, %v1484_v50  ;;  %v1624_v56 = vpack.c.bf16 %v1612_v49, %v1612_v49 }
 0x3c9   :  { %v1601_v53 = vmul.f32 %v2387_v0, %v1593_v52  ;;  %v1648_v58 = vunpack.c.l.b16 %v1624_v56 }
 0x3cb   :  { %v1609_v54 = vadd.f32 %v2388_v23, %v1601_v53 }
 0x3cd   :  { %v1613_v55 = vmax.f32 %v1609_v54, 0.0 }
 0x3cf   :  { %1617 = vst [vmem:[#allocation3 + $0x20] sm:$0xff] %v1613_v55  ;;  %v1625_v57 = vpack.c.bf16 %v1613_v55, %v1613_v55 }
 0x3d1   :  { %v1649_v59 = vunpack.c.l.b16 %v1625_v57 }
 0x3d3   :  { %v1651_v60 = vpack.c.b16 %v1649_v59, %v1648_v58 }
 0x3d5   :  { %1715 = vmatmul.bf16.vlgmr.msrb.gmra.mxu2 %v1651_v60 }
 0x442   :  { %v1711_v63 = vpop.f32.mrf.mxu1 }
 0x443   :  { %v1725_v1 = vmul.f32 %v2389_v61, %v1711_v63 }
 0x445   :  { %v1733_v2 = vadd.f32 %v2390_v62, %v1725_v1 }
 0x447   :  { %v1737_v3 = vmax.f32 %v1733_v2, 0.0 }
 0x449   :  { %1741 = vst.msk [vmem:[#allocation12] sm:$0xff] %vm131_vm0, %v1737_v3  ;;  %1783 = vrot.lane.b32.xlu0 %v1737_v3, %s2527_s8  ;;  %1749 = vrot.lane.b32.xlu2 %v1737_v3, %s2528_s9 }
 0x44a   :  { %v1713_v4 = vpop.f32.mrf.mxu1 }
 0x44b   :  { %v1726_v5 = vmul.f32 %v2389_v61, %v1713_v4 }
 0x44d   :  { %v1734_v6 = vadd.f32 %v2390_v62, %v1726_v5 }
 0x44f   :  { %v1738_v7 = vmax.f32 %v1734_v6, 0.0 }
 0x451   :  { %1742 = vst.msk [vmem:[#allocation12 + $0x8] sm:$0xff] %vm131_vm0, %v1738_v7  ;;  %1766 = vrot.lane.b32.xlu2 %v1737_v3, %s2529_s17  ;;  %1768 = vrot.lane.b32.xlu0 %v1738_v7, %s2529_s17 }
 0x458   :  { %v1716_v8 = vpop.f32.mrf.mxu2 }
 0x459   :  { %v1727_v9 = vmul.f32 %v2389_v61, %v1716_v8  ;;  %1751 = vrot.lane.b32.xlu2 %v1738_v7, %s2528_s9 }
 0x45b   :  { %v1735_v10 = vadd.f32 %v2390_v62, %v1727_v9 }
 0x45d   :  { %v1739_v11 = vmax.f32 %v1735_v10, 0.0 }
 0x45f   :  { %1743 = vst.msk [vmem:[#allocation12 + $0x40] sm:$0xff] %vm131_vm0, %v1739_v11  ;;  %1770 = vrot.lane.b32.xlu1 %v1739_v11, %s2529_s17  ;;  %1753 = vrot.lane.b32.xlu0 %v1739_v11, %s2528_s9 }
 0x460   :  { %v1718_v12 = vpop.f32.mrf.mxu2 }
 0x461   :  { %v1728_v13 = vmul.f32 %v2389_v61, %v1718_v12 }
 0x463   :  { %v1736_v14 = vadd.f32 %v2390_v62, %v1728_v13 }
 0x465   :  { %v1740_v15 = vmax.f32 %v1736_v14, 0.0 }
 0x467   :  { %1744 = vst.msk [vmem:[#allocation12 + $0x48] sm:$0xff] %vm131_vm0, %v1740_v15  ;;  %1789 = vrot.lane.b32.xlu0 %v1740_v15, %s2527_s8  ;;  %1772 = vrot.lane.b32.xlu2 %v1740_v15, %s2529_s17 }
 0x468   :  { %1755 = vrot.lane.b32.xlu1 %v1740_v15, %s2528_s9 }
 0x46f   :  { %1787 = vrot.lane.b32.xlu2 %v1739_v11, %s2527_s8 }
 0x470   :  { %1785 = vrot.lane.b32.xlu1 %v1738_v7, %s2527_s8 }
 0x4a3   :  { %v1750_v16 = vpop.permute.xlu2 %1749 }
 0x4a4   :  { %1762 = vst.msk [vmem:[#allocation12 + $0x10] sm:$0xff] %vm131_vm0, %v1750_v16 }
 0x4ab   :  { %v1767_v17 = vpop.permute.xlu2 %1766 }
 0x4ac   :  { %1779 = vst.msk [vmem:[#allocation12 + $0x20] sm:$0xff] %vm131_vm0, %v1767_v17 }
 0x4b3   :  { %v1752_v18 = vpop.permute.xlu2 %1751 }
 0x4b4   :  { %1763 = vst.msk [vmem:[#allocation12 + $0x18] sm:$0xff] %vm131_vm0, %v1752_v18 }
 0x4bb   :  { %v1784_v19 = vpop.permute.xlu0 %1783 }
 0x4bc   :  { %1796 = vst.msk [vmem:[#allocation12 + $0x30] sm:$0xff] %vm131_vm0, %v1784_v19 }
 0x4c1   :  { %v1773_v20 = vpop.permute.xlu2 %1772 }
 0x4c2   :  { %1782 = vst.msk [vmem:[#allocation12 + $0x68] sm:$0xff] %vm131_vm0, %v1773_v20 }
 0x4c3   :  { %v1769_v21 = vpop.permute.xlu0 %1768 }
 0x4c4   :  { %1780 = vst.msk [vmem:[#allocation12 + $0x28] sm:$0xff] %vm131_vm0, %v1769_v21 }
 0x4c9   :  { %v1788_v0 = vpop.permute.xlu2 %1787 }
 0x4ca   :  { %1798 = vst.msk [vmem:[#allocation12 + $0x70] sm:$0xff] %vm131_vm0, %v1788_v0 }
 0x4d1   :  { %v1771_v22 = vpop.permute.xlu1 %1770  ;;  %v1754_v23 = vpop.permute.xlu0 %1753 }
 0x4d2   :  { %1781 = vst.msk [vmem:[#allocation12 + $0x60] sm:$0xff] %vm131_vm0, %v1771_v22 }
 0x4d3   :  { %1764 = vst.msk [vmem:[#allocation12 + $0x50] sm:$0xff] %vm131_vm0, %v1754_v23 }
 0x4d9   :  { %v1790_v24 = vpop.permute.xlu0 %1789 }
 0x4da   :  { %1799 = vst.msk [vmem:[#allocation12 + $0x78] sm:$0xff] %vm131_vm0, %v1790_v24  ;;  %v1756_v25 = vpop.permute.xlu1 %1755 }
 0x4db   :  { %1765 = vst.msk [vmem:[#allocation12 + $0x58] sm:$0xff] %vm131_vm0, %v1756_v25 }
 0x4e2   :  { %v1786_v26 = vpop.permute.xlu1 %1785 }
 0x4e3   :  { %1797 = vst.msk [vmem:[#allocation12 + $0x38] sm:$0xff] %vm131_vm0, %v1786_v26 }
 0x4e4   :  { %1812 = dma.vmem_to_hbm [thread:$0]  %s1805_s22, 2048, %s1807_s12, [#allocation6], %s2531_s20, %s2531_s20, %s2532_s10  }
 0x4e5   :  { %2517 = dma.done.wait [#allocation6], 2048  }
 0x4e6   :  { %2518 = vsyncadd [#allocation6], 4294965248 }
 0x4e7   :  { %1817 = vsyncpa [#allocation5], 1 }
 0x4e8   :  { %1818 = vsyncpa [#allocation8], 1 }
 0x4e9   :  { %1819 = vsyncpa [#allocation11], 1 }
 0x4ea   :  { %1820 = vsyncpa [#allocation6], 1 }

</bundles_post_ra>
